<compile_context>
chip_gen: v7x
topology: tpu7x:2x2x1
jax: 0.10.0
libtpu: 0.0.40
codegen_flags: <defaults>
</compile_context>

<pallas_src>
import functools
import math

import jax
import jax.numpy as jnp
from jax.experimental import pallas as pl
from jax.experimental.pallas import tpu as pltpu


def _vmem_limit_bytes():
    """Scoped-VMEM budget derived from physical capacity (v7x has only 64 MiB)."""
    try:
        cap = int(pltpu.get_tpu_info().vmem_capacity_bytes)
        return int(min(max(cap - 16 * 1024 * 1024, 32 * 1024 * 1024),
                       100 * 1024 * 1024))
    except Exception:
        return 48 * 1024 * 1024


VMEM_LIMIT = _vmem_limit_bytes()


# ---------------------------------------------------------------------------
# helpers
# ---------------------------------------------------------------------------

def _round_up(x, m):
    return (x + m - 1) // m * m


# ---------------------------------------------------------------------------
# Pallas kernels
# ---------------------------------------------------------------------------

def _linear_kernel(x_ref, w_ref, b_ref, o_ref, acc_ref, *, relu):
    """Tiled matmul with K-axis accumulation: o = [relu](x @ w + b)."""
    @pl.when(pl.program_id(2) == 0)
    def _():
        acc_ref[...] = jnp.zeros_like(acc_ref)

    acc_ref[...] += jnp.dot(x_ref[...], w_ref[...],
                            preferred_element_type=jnp.float32)

    @pl.when(pl.program_id(2) == pl.num_programs(2) - 1)
    def _():
        y = acc_ref[...] + b_ref[...]
        if relu:
            y = jnp.maximum(y, 0.0)
        o_ref[...] = y.astype(o_ref.dtype)


def linear(x2d, w, b, relu=False, out_dtype=jnp.bfloat16, tm=256, tn=512, tk=512):
    """x2d: (M, K) bf16, w: (K, N) bf16, b: (N,) f32 -> (M, N) out_dtype.
    Grid (M, N, K); bf16 MXU matmuls with an f32 VMEM accumulator on the K axis."""
    x2d = x2d.astype(jnp.bfloat16)
    w = w.astype(jnp.bfloat16)
    M, K = x2d.shape
    N = w.shape[1]

    tm_ = M if M <= tm else tm
    Mp = M if M <= tm else _round_up(M, tm_)
    tn_ = N if N <= tn else tn
    Np = N if N <= tn else _round_up(N, tn_)
    tk_ = K if K <= tk else tk
    Kp = K if K <= tk else _round_up(K, tk_)

    if Mp != M or Kp != K:
        x2d = jnp.pad(x2d, ((0, Mp - M), (0, Kp - K)))
    if Kp != K or Np != N:
        w = jnp.pad(w, ((0, Kp - K), (0, Np - N)))
    if Np != N:
        b = jnp.pad(b, (0, Np - N))

    grid = (Mp // tm_, Np // tn_, Kp // tk_)
    out = pl.pallas_call(
        functools.partial(_linear_kernel, relu=relu),
        grid=grid,
        in_specs=[
            pl.BlockSpec((tm_, tk_), lambda i, j, k: (i, k)),
            pl.BlockSpec((tk_, tn_), lambda i, j, k: (k, j)),
            pl.BlockSpec((1, tn_), lambda i, j, k: (0, j)),
        ],
        out_specs=pl.BlockSpec((tm_, tn_), lambda i, j, k: (i, j)),
        out_shape=jax.ShapeDtypeStruct((Mp, Np), out_dtype),
        scratch_shapes=[pltpu.VMEM((tm_, tn_), jnp.float32)],
        compiler_params=pltpu.CompilerParams(
            dimension_semantics=("parallel", "parallel", "arbitrary"),
            vmem_limit_bytes=VMEM_LIMIT),
    )(x2d, w, b.reshape(1, Np))
    if Mp != M or Np != N:
        out = out[:M, :N]
    return out


def _linear_ln_kernel(x_ref, w_ref, b_ref, r_ref, g_ref, bt_ref, o_ref, acc_ref,
                      *, eps):
    """o = LayerNorm(residual + x @ w + b) with K-axis accumulation; LN in f32."""
    @pl.when(pl.program_id(1) == 0)
    def _():
        acc_ref[...] = jnp.zeros_like(acc_ref)

    acc_ref[...] += jnp.dot(x_ref[...], w_ref[...],
                            preferred_element_type=jnp.float32)

    @pl.when(pl.program_id(1) == pl.num_programs(1) - 1)
    def _():
        z = acc_ref[...] + b_ref[...] + r_ref[...].astype(jnp.float32)
        mean = jnp.mean(z, axis=-1, keepdims=True)
        var = jnp.mean((z - mean) ** 2, axis=-1, keepdims=True)
        o_ref[...] = ((z - mean) * jax.lax.rsqrt(var + eps)
                      * g_ref[...] + bt_ref[...]).astype(o_ref.dtype)


def linear_add_layernorm(x2d, w, b, res2d, gamma, beta, eps=1e-5,
                         out_dtype=jnp.bfloat16, tm=256, tk=512):
    """Fused (x @ w + b) + residual followed by LayerNorm over the last dim."""
    x2d = x2d.astype(jnp.bfloat16)
    w = w.astype(jnp.bfloat16)
    res2d = res2d.astype(jnp.bfloat16)
    M, K = x2d.shape
    N = w.shape[1]                           # = d_model; LN needs full width

    tm_ = M if M <= tm else tm
    Mp = M if M <= tm else _round_up(M, tm_)
    tk_ = K if K <= tk else tk
    Kp = K if K <= tk else _round_up(K, tk_)

    if Mp != M or Kp != K:
        x2d = jnp.pad(x2d, ((0, Mp - M), (0, Kp - K)))
    if Mp != M:
        res2d = jnp.pad(res2d, ((0, Mp - M), (0, 0)))
    if Kp != K:
        w = jnp.pad(w, ((0, Kp - K), (0, 0)))

    grid = (Mp // tm_, Kp // tk_)
    out = pl.pallas_call(
        functools.partial(_linear_ln_kernel, eps=eps),
        grid=grid,
        in_specs=[
            pl.BlockSpec((tm_, tk_), lambda i, k: (i, k)),
            pl.BlockSpec((tk_, N), lambda i, k: (k, 0)),
            pl.BlockSpec((1, N), lambda i, k: (0, 0)),
            pl.BlockSpec((tm_, N), lambda i, k: (i, 0)),
            pl.BlockSpec((1, N), lambda i, k: (0, 0)),
            pl.BlockSpec((1, N), lambda i, k: (0, 0)),
        ],
        out_specs=pl.BlockSpec((tm_, N), lambda i, k: (i, 0)),
        out_shape=jax.ShapeDtypeStruct((Mp, N), out_dtype),
        scratch_shapes=[pltpu.VMEM((tm_, N), jnp.float32)],
        compiler_params=pltpu.CompilerParams(
            dimension_semantics=("parallel", "arbitrary"),
            vmem_limit_bytes=VMEM_LIMIT),
    )(x2d, w, b.reshape(1, N), res2d, gamma.reshape(1, N), beta.reshape(1, N))
    return out[:M] if Mp != M else out


def _mha_kernel(q_ref, k_ref, v_ref, pad_ref, o_ref, *, num_heads, scale, causal, tq):
    """Multi-head attention for one (batch, q-tile) block.
    q (1,tq,D) bf16, k/v (1,Skv,D) bf16, key-pad row (1,1,Skv) int32, out (1,tq,D) bf16."""
    q = q_ref[0]                          # (tq, D)
    k = k_ref[0]                          # (Skv, D)
    v = v_ref[0]                          # (Skv, D)
    Sq, D = q.shape
    Skv = k.shape[0]
    dk = D // num_heads

    # mask = key padding row, broadcast over queries; causal part built in-kernel.
    mask = jnp.broadcast_to(pad_ref[0] != 0, (Sq, Skv))
    if causal:
        row = (pl.program_id(1) * tq
               + jax.lax.broadcasted_iota(jnp.int32, (Sq, Skv), 0))
        col = jax.lax.broadcasted_iota(jnp.int32, (Sq, Skv), 1)
        mask = jnp.logical_and(mask, col <= row)

    for h in range(num_heads):            # static unroll; per-head store, no concat
        lo = h * dk
        s = jax.lax.dot_general(q[:, lo:lo + dk], k[:, lo:lo + dk],
                                (((1,), (1,)), ((), ())),
                                preferred_element_type=jnp.float32) * scale
        s = jnp.where(mask, s, -1e30)     # finite fill -> no NaN on fully-masked rows
        m = jnp.max(s, axis=-1, keepdims=True)
        p = jnp.exp(s - m)
        denom = jnp.sum(p, axis=-1, keepdims=True)
        attn = (p * pl.reciprocal(denom, approx=True)).astype(jnp.bfloat16)
        o_ref[0, :, lo:lo + dk] = jnp.dot(
            attn, v[:, lo:lo + dk],
            preferred_element_type=jnp.float32).astype(o_ref.dtype)


def multi_head_attention_core(q, k, v, key_pad, num_heads, causal, tq=256):
    """q: (B,Sq,D), k/v: (B,Skv,D) bf16, key_pad: (B,1,Skv) int32 -> (B,Sq,D) bf16."""
    B, Sq, D = q.shape
    Skv = k.shape[1]
    scale = 1.0 / math.sqrt(D // num_heads)

    tq_ = Sq if Sq <= tq else tq
    Sqp = Sq if Sq <= tq else _round_up(Sq, tq_)
    if Sqp != Sq:
        q = jnp.pad(q, ((0, 0), (0, Sqp - Sq), (0, 0)))

    out = pl.pallas_call(
        functools.partial(_mha_kernel, num_heads=num_heads, scale=scale,
                          causal=causal, tq=tq_),
        grid=(B, Sqp // tq_),
        in_specs=[
            pl.BlockSpec((1, tq_, D), lambda b, qi: (b, qi, 0)),
            pl.BlockSpec((1, Skv, D), lambda b, qi: (b, 0, 0)),
            pl.BlockSpec((1, Skv, D), lambda b, qi: (b, 0, 0)),
            pl.BlockSpec((1, 1, Skv), lambda b, qi: (b, 0, 0)),
        ],
        out_specs=pl.BlockSpec((1, tq_, D), lambda b, qi: (b, qi, 0)),
        out_shape=jax.ShapeDtypeStruct((B, Sqp, D), jnp.bfloat16),
        compiler_params=pltpu.CompilerParams(
            dimension_semantics=("parallel", "parallel"),
            vmem_limit_bytes=VMEM_LIMIT),
    )(q.astype(jnp.bfloat16), k.astype(jnp.bfloat16), v.astype(jnp.bfloat16),
      key_pad)
    return out[:, :Sq] if Sqp != Sq else out


# ---------------------------------------------------------------------------
# Module-level forward (glue in plain JAX, hot paths in Pallas)
# ---------------------------------------------------------------------------

def mha_block(p, query, kv_src, key_pad, num_heads, self_attn, causal=False):
    """Returns attention context (B*Sq, D) bf16 BEFORE the output projection
    (out-proj is fused with the following add&LayerNorm by the caller)."""
    B, Sq, D = query.shape
    Skv = kv_src.shape[1]
    q2d = query.reshape(B * Sq, D)
    if self_attn:
        qkv = linear(q2d, p["wqkv"], p["bqkv"]).reshape(B, Sq, 3 * D)
        q, k, v = qkv[..., :D], qkv[..., D:2 * D], qkv[..., 2 * D:]
    else:  # cross attention: weights pre-split at init (no in-trace weight slicing)
        q = linear(q2d, p["wq"], p["bq"]).reshape(B, Sq, D)
        kv = linear(kv_src.reshape(B * Skv, D), p["wkv"], p["bkv"])
        kv = kv.reshape(B, Skv, 2 * D)
        k, v = kv[..., :D], kv[..., D:]
    ctx = multi_head_attention_core(q, k, v, key_pad, num_heads, causal)
    return ctx.reshape(B * Sq, D)


def encoder_layer(p, x, src_pad, num_heads):
    B, S, D = x.shape
    x2d = x.reshape(B * S, D)
    ctx = mha_block(p["self_attn"], x, x, src_pad, num_heads, self_attn=True)
    x2d = linear_add_layernorm(ctx, p["self_attn"]["wo"], p["self_attn"]["bo"],
                               x2d, p["norm1_g"], p["norm1_b"])
    h = linear(x2d, p["ff_w1"], p["ff_b1"], relu=True)
    x2d = linear_add_layernorm(h, p["ff_w2"], p["ff_b2"],
                               x2d, p["norm2_g"], p["norm2_b"])
    return x2d.reshape(B, S, D)


def decoder_layer(p, x, enc, src_pad, tgt_pad, num_heads):
    B, St, D = x.shape
    x2d = x.reshape(B * St, D)
    # 1) masked self attention + add & norm (dropout = identity)
    ctx = mha_block(p["self_attn"], x, x, tgt_pad, num_heads,
                    self_attn=True, causal=True)
    x2d = linear_add_layernorm(ctx, p["self_attn"]["wo"], p["self_attn"]["bo"],
                               x2d, p["norm1_g"], p["norm1_b"])
    x = x2d.reshape(B, St, D)
    # 2) cross attention + add & norm
    ctx = mha_block(p["cross_attn"], x, enc, src_pad, num_heads, self_attn=False)
    x2d = linear_add_layernorm(ctx, p["cross_attn"]["wo"], p["cross_attn"]["bo"],
                               x2d, p["norm2_g"], p["norm2_b"])
    # 3) position-wise feed forward + add & norm
    h = linear(x2d, p["ff_w1"], p["ff_b1"], relu=True)
    x2d = linear_add_layernorm(h, p["ff_w2"], p["ff_b2"],
                               x2d, p["norm3_g"], p["norm3_b"])
    return x2d.reshape(B, St, D)


def transformer_forward(params, src, tgt, num_heads):
    D = params["emb"].shape[1]
    B, Ss = src.shape
    St = tgt.shape[1]

    # key-padding rows only (B, 1, Skv); causal part is generated inside the kernel
    src_pad = (src != 0).astype(jnp.int32).reshape(B, 1, Ss)
    tgt_pad = (tgt != 0).astype(jnp.int32).reshape(B, 1, St)

    # TODO(synk): embedding gather + positional encoding kept in plain JAX.
    pe = params["pe"]
    enc = (params["emb"][src] * math.sqrt(D) + pe[:Ss]).astype(jnp.bfloat16)
    dec = (params["emb"][tgt] * math.sqrt(D) + pe[:St]).astype(jnp.bfloat16)

    for lp in params["enc_layers"]:
        enc = encoder_layer(lp, enc, src_pad, num_heads)

    x = dec
    for lp in params["dec_layers"]:
        x = decoder_layer(lp, x, enc, src_pad, tgt_pad, num_heads)

    logits = linear(x.reshape(B * St, D), params["fc_w"], params["fc_b"],
                    out_dtype=jnp.float32)
    return logits.reshape(B, St, -1)


# ---------------------------------------------------------------------------
# Deterministic parameter init (shapes per the PyTorch modules)
# ---------------------------------------------------------------------------

def _linear_init(key, din, dout):
    bound = 1.0 / math.sqrt(din)
    w = jax.random.uniform(key, (din, dout), jnp.float32, -bound, bound)
    b = jax.random.uniform(jax.random.fold_in(key, 1), (dout,),
                           jnp.float32, -bound, bound)
    return w.astype(jnp.bfloat16), b          # weights stored bf16, bias f32


def _mha_init(key, d_model, fuse_qkv):
    kq, kk, kv, ko = jax.random.split(key, 4)
    wq, bq = _linear_init(kq, d_model, d_model)
    wk, bk = _linear_init(kk, d_model, d_model)
    wv, bv = _linear_init(kv, d_model, d_model)
    wo, bo = _linear_init(ko, d_model, d_model)
    if fuse_qkv:   # self-attention: one fused (D, 3D) projection
        return dict(wqkv=jnp.concatenate([wq, wk, wv], axis=1),
                    bqkv=jnp.concatenate([bq, bk, bv]),
                    wo=wo, bo=bo)
    # cross-attention: q separate (on decoder stream), kv fused (on encoder stream)
    return dict(wq=wq, bq=bq,
                wkv=jnp.concatenate([wk, wv], axis=1),
                bkv=jnp.concatenate([bk, bv]),
                wo=wo, bo=bo)


def _ln_init(d_model):
    return jnp.ones((d_model,), jnp.float32), jnp.zeros((d_model,), jnp.float32)


def _enc_layer_init(key, d_model, d_ff):
    k1, k2, k3 = jax.random.split(key, 3)
    sa = _mha_init(k1, d_model, fuse_qkv=True)
    w1, b1 = _linear_init(k2, d_model, d_ff)
    w2, b2 = _linear_init(k3, d_ff, d_model)
    n1g, n1b = _ln_init(d_model)
    n2g, n2b = _ln_init(d_model)
    return dict(self_attn=sa, ff_w1=w1, ff_b1=b1, ff_w2=w2, ff_b2=b2,
                norm1_g=n1g, norm1_b=n1b, norm2_g=n2g, norm2_b=n2b)


def _dec_layer_init(key, d_model, d_ff):
    k1, k2, k3, k4 = jax.random.split(key, 4)
    sa = _mha_init(k1, d_model, fuse_qkv=True)
    ca = _mha_init(k2, d_model, fuse_qkv=False)
    w1, b1 = _linear_init(k3, d_model, d_ff)
    w2, b2 = _linear_init(k4, d_ff, d_model)
    n1g, n1b = _ln_init(d_model)
    n2g, n2b = _ln_init(d_model)
    n3g, n3b = _ln_init(d_model)
    return dict(self_attn=sa, cross_attn=ca,
                ff_w1=w1, ff_b1=b1, ff_w2=w2, ff_b2=b2,
                norm1_g=n1g, norm1_b=n1b, norm2_g=n2g, norm2_b=n2b,
                norm3_g=n3g, norm3_b=n3b)


def _positional_encoding(max_len, d_model):
    pos = jnp.arange(max_len, dtype=jnp.float32)[:, None]
    div = jnp.exp(jnp.arange(0, d_model, 2, dtype=jnp.float32)
                  * (-math.log(10000.0) / d_model))
    pe = jnp.zeros((max_len, d_model), jnp.float32)
    pe = pe.at[:, 0::2].set(jnp.sin(pos * div))
    pe = pe.at[:, 1::2].set(jnp.cos(pos * div))
    return pe


def init_params(key, vocab_size, d_model, num_heads, n_enc, n_dec, d_ff, max_len):
    k_emb, k_fc, k_enc, k_dec = jax.random.split(key, 4)
    emb = jax.random.uniform(k_emb, (vocab_size, d_model), jnp.float32, -0.1, 0.1)
    emb = emb.at[0].set(0.0)                                  # padding_idx=0
    xav = math.sqrt(6.0 / (d_model + vocab_size))
    fc_w = jax.random.uniform(k_fc, (d_model, vocab_size),
                              jnp.float32, -xav, xav).astype(jnp.bfloat16)
    fc_b = jnp.zeros((vocab_size,), jnp.float32)
    enc_layers = [_enc_layer_init(k, d_model, d_ff)
                  for k in jax.random.split(k_enc, n_enc)]
    dec_layers = [_dec_layer_init(k, d_model, d_ff)
                  for k in jax.random.split(k_dec, n_dec)]
    return dict(emb=emb, pe=_positional_encoding(max_len, d_model),
                fc_w=fc_w, fc_b=fc_b,
                enc_layers=enc_layers, dec_layers=dec_layers)


# ---------------------------------------------------------------------------
if __name__ == "__main__":
    VOCAB = 128
    D_MODEL, NUM_HEADS, D_FF = 32, 4, 64
    N_ENC, N_DEC = 2, 2
    MAX_LEN = 16
    B, S_SRC, S_TGT = 2, 8, 8

    root = jax.random.PRNGKey(0)
    k_p, k_s, k_t = jax.random.split(root, 3)

    params = init_params(k_p, VOCAB, D_MODEL, NUM_HEADS, N_ENC, N_DEC, D_FF, MAX_LEN)

    src = jax.random.randint(k_s, (B, S_SRC), 1, VOCAB, dtype=jnp.int32)
    tgt = jax.random.randint(k_t, (B, S_TGT), 1, VOCAB, dtype=jnp.int32)
    src = src.at[1, -1].set(0)   # one pad token to exercise the padding mask path

    fwd = jax.jit(functools.partial(transformer_forward, num_heads=NUM_HEADS))
    out = fwd(params, src, tgt)
    out = jax.block_until_ready(out)

    assert out.shape == (B, S_TGT, VOCAB)
    assert bool(jnp.all(jnp.isfinite(out)))
    print("KERNEL_OK")
</pallas_src>

<mosaic_0001>
module attributes {stable_mosaic.version = 11 : i64} {
  func.func @_linear_kernel(%arg0: i32, %arg1: i32, %arg2: i32, %arg3: memref<16x32xbf16, #tpu.memory_space<vmem>>, %arg4: memref<32x96xbf16, #tpu.memory_space<vmem>>, %arg5: memref<1x96xf32, #tpu.memory_space<vmem>>, %arg6: memref<16x96xbf16, #tpu.memory_space<vmem>>, %arg7: memref<16x96xf32, #tpu.memory_space<vmem>>) attributes {dimension_semantics = [#tpu.dimension_semantics<parallel>, #tpu.dimension_semantics<parallel>, #tpu.dimension_semantics<arbitrary>], iteration_bounds = array<i64: 1, 1, 1>, scalar_prefetch = 0 : i64, scratch_operands = 1 : i64, tpu.core_type = #tpu.core_type<tc>, window_params = [{transform_indices = @transform_0, window_bounds = array<i64: 16, 32>}, {transform_indices = @transform_1, window_bounds = array<i64: 32, 96>}, {transform_indices = @transform_2, window_bounds = array<i64: 1, 96>}, {transform_indices = @transform_3, window_bounds = array<i64: 16, 96>}]} {
    %c0_i32 = arith.constant 0 : i32
    %0 = arith.cmpi eq, %arg2, %c0_i32 : i32
    %1 = arith.extui %0 : i1 to i32
    %c0_i32_0 = arith.constant 0 : i32
    %2 = arith.cmpi ne, %1, %c0_i32_0 : i32
    scf.if %2 {
      %cst_10 = arith.constant 0.000000e+00 : f32
      %12 = vector.broadcast %cst_10 : f32 to vector<16x96xf32>
      %c0_11 = arith.constant 0 : index
      %c0_12 = arith.constant 0 : index
      %13 = vector.load %arg7[%c0_11, %c0_12] : memref<16x96xf32, #tpu.memory_space<vmem>>, vector<16x96xf32>
      tpu.vector_store %arg7[%c0_11, %c0_12], %12 {strides = array<i32>} : memref<16x96xf32, #tpu.memory_space<vmem>>, vector<16x96xf32>,
    } else {
    }
    %c0 = arith.constant 0 : index
    %c0_1 = arith.constant 0 : index
    %3 = vector.load %arg7[%c0, %c0_1] : memref<16x96xf32, #tpu.memory_space<vmem>>, vector<16x96xf32>
    %c0_2 = arith.constant 0 : index
    %c0_3 = arith.constant 0 : index
    %4 = vector.load %arg3[%c0_2, %c0_3] : memref<16x32xbf16, #tpu.memory_space<vmem>>, vector<16x32xbf16>
    %c0_4 = arith.constant 0 : index
    %c0_5 = arith.constant 0 : index
    %5 = vector.load %arg4[%c0_4, %c0_5] : memref<32x96xbf16, #tpu.memory_space<vmem>>, vector<32x96xbf16>
    %cst = arith.constant dense<0.000000e+00> : vector<16x96xf32>
    %6 = tpu.matmul %4, %5, %cst {dimension_numbers = #tpu.dot_dimension_numbers<[1], [0], [0], [1], [0, 0, 1, 1], [], []>} : vector<16x32xbf16>, vector<32x96xbf16>, vector<16x96xf32> -> vector<16x96xf32>
    %7 = arith.addf %3, %6 : vector<16x96xf32>
    %c0_6 = arith.constant 0 : index
    %c0_7 = arith.constant 0 : index
    %8 = vector.load %arg7[%c0_6, %c0_7] : memref<16x96xf32, #tpu.memory_space<vmem>>, vector<16x96xf32>
    tpu.vector_store %arg7[%c0_6, %c0_7], %7 {strides = array<i32>} : memref<16x96xf32, #tpu.memory_space<vmem>>, vector<16x96xf32>,
    %c0_i32_8 = arith.constant 0 : i32
    %9 = arith.cmpi eq, %arg2, %c0_i32_8 : i32
    %10 = arith.extui %9 : i1 to i32
    %c0_i32_9 = arith.constant 0 : i32
    %11 = arith.cmpi ne, %10, %c0_i32_9 : i32
    scf.if %11 {
      %c0_10 = arith.constant 0 : index
      %c0_11 = arith.constant 0 : index
      %12 = vector.load %arg7[%c0_10, %c0_11] : memref<16x96xf32, #tpu.memory_space<vmem>>, vector<16x96xf32>
      %c0_12 = arith.constant 0 : index
      %c0_13 = arith.constant 0 : index
      %13 = vector.load %arg5[%c0_12, %c0_13] : memref<1x96xf32, #tpu.memory_space<vmem>>, vector<1x96xf32>
      %14 = vector.broadcast %13 : vector<1x96xf32> to vector<16x96xf32>
      %15 = arith.addf %12, %14 : vector<16x96xf32>
      %16 = arith.truncf %15 : vector<16x96xf32> to vector<16x96xbf16>
      %c0_14 = arith.constant 0 : index
      %c0_15 = arith.constant 0 : index
      %17 = vector.load %arg6[%c0_14, %c0_15] : memref<16x96xbf16, #tpu.memory_space<vmem>>, vector<16x96xbf16>
      tpu.vector_store %arg6[%c0_14, %c0_15], %16 {strides = array<i32>} : memref<16x96xbf16, #tpu.memory_space<vmem>>, vector<16x96xbf16>,
    } else {
    }
    return
  }
  func.func @transform_0(%arg0: i32, %arg1: i32, %arg2: i32) -> (i32, i32) {
    %c0_i32 = arith.constant 0 : i32
    return %arg0, %arg2 : i32, i32
  }
  func.func @transform_1(%arg0: i32, %arg1: i32, %arg2: i32) -> (i32, i32) {
    %c0_i32 = arith.constant 0 : i32
    return %arg2, %arg1 : i32, i32
  }
  func.func @transform_2(%arg0: i32, %arg1: i32, %arg2: i32) -> (i32, i32) {
    %c0_i32 = arith.constant 0 : i32
    %c0_i32_0 = arith.constant 0 : i32
    return %c0_i32, %arg1 : i32, i32
  }
  func.func @transform_3(%arg0: i32, %arg1: i32, %arg2: i32) -> (i32, i32) {
    %c0_i32 = arith.constant 0 : i32
    return %arg0, %arg1 : i32, i32
  }
}

module attributes {stable_mosaic.version = 11 : i64} {
  func.func @_linear_kernel(%arg0: i32, %arg1: i32, %arg2: i32, %arg3: memref<16x32xbf16, #tpu.memory_space<vmem>>, %arg4: memref<32x64xbf16, #tpu.memory_space<vmem>>, %arg5: memref<1x64xf32, #tpu.memory_space<vmem>>, %arg6: memref<16x64xbf16, #tpu.memory_space<vmem>>, %arg7: memref<16x64xf32, #tpu.memory_space<vmem>>) attributes {dimension_semantics = [#tpu.dimension_semantics<parallel>, #tpu.dimension_semantics<parallel>, #tpu.dimension_semantics<arbitrary>], iteration_bounds = array<i64: 1, 1, 1>, scalar_prefetch = 0 : i64, scratch_operands = 1 : i64, tpu.core_type = #tpu.core_type<tc>, window_params = [{transform_indices = @transform_0, window_bounds = array<i64: 16, 32>}, {transform_indices = @transform_1, window_bounds = array<i64: 32, 64>}, {transform_indices = @transform_2, window_bounds = array<i64: 1, 64>}, {transform_indices = @transform_3, window_bounds = array<i64: 16, 64>}]} {
    %c0_i32 = arith.constant 0 : i32
    %0 = arith.cmpi eq, %arg2, %c0_i32 : i32
    %1 = arith.extui %0 : i1 to i32
    %c0_i32_0 = arith.constant 0 : i32
    %2 = arith.cmpi ne, %1, %c0_i32_0 : i32
    scf.if %2 {
      %cst_10 = arith.constant 0.000000e+00 : f32
      %12 = vector.broadcast %cst_10 : f32 to vector<16x64xf32>
      %c0_11 = arith.constant 0 : index
      %c0_12 = arith.constant 0 : index
      %13 = vector.load %arg7[%c0_11, %c0_12] : memref<16x64xf32, #tpu.memory_space<vmem>>, vector<16x64xf32>
      tpu.vector_store %arg7[%c0_11, %c0_12], %12 {strides = array<i32>} : memref<16x64xf32, #tpu.memory_space<vmem>>, vector<16x64xf32>,
    } else {
    }
    %c0 = arith.constant 0 : index
    %c0_1 = arith.constant 0 : index
    %3 = vector.load %arg7[%c0, %c0_1] : memref<16x64xf32, #tpu.memory_space<vmem>>, vector<16x64xf32>
    %c0_2 = arith.constant 0 : index
    %c0_3 = arith.constant 0 : index
    %4 = vector.load %arg3[%c0_2, %c0_3] : memref<16x32xbf16, #tpu.memory_space<vmem>>, vector<16x32xbf16>
    %c0_4 = arith.constant 0 : index
    %c0_5 = arith.constant 0 : index
    %5 = vector.load %arg4[%c0_4, %c0_5] : memref<32x64xbf16, #tpu.memory_space<vmem>>, vector<32x64xbf16>
    %cst = arith.constant dense<0.000000e+00> : vector<16x64xf32>
    %6 = tpu.matmul %4, %5, %cst {dimension_numbers = #tpu.dot_dimension_numbers<[1], [0], [0], [1], [0, 0, 1, 1], [], []>} : vector<16x32xbf16>, vector<32x64xbf16>, vector<16x64xf32> -> vector<16x64xf32>
    %7 = arith.addf %3, %6 : vector<16x64xf32>
    %c0_6 = arith.constant 0 : index
    %c0_7 = arith.constant 0 : index
    %8 = vector.load %arg7[%c0_6, %c0_7] : memref<16x64xf32, #tpu.memory_space<vmem>>, vector<16x64xf32>
    tpu.vector_store %arg7[%c0_6, %c0_7], %7 {strides = array<i32>} : memref<16x64xf32, #tpu.memory_space<vmem>>, vector<16x64xf32>,
    %c0_i32_8 = arith.constant 0 : i32
    %9 = arith.cmpi eq, %arg2, %c0_i32_8 : i32
    %10 = arith.extui %9 : i1 to i32
    %c0_i32_9 = arith.constant 0 : i32
    %11 = arith.cmpi ne, %10, %c0_i32_9 : i32
    scf.if %11 {
      %c0_10 = arith.constant 0 : index
      %c0_11 = arith.constant 0 : index
      %12 = vector.load %arg7[%c0_10, %c0_11] : memref<16x64xf32, #tpu.memory_space<vmem>>, vector<16x64xf32>
      %c0_12 = arith.constant 0 : index
      %c0_13 = arith.constant 0 : index
      %13 = vector.load %arg5[%c0_12, %c0_13] : memref<1x64xf32, #tpu.memory_space<vmem>>, vector<1x64xf32>
      %14 = vector.broadcast %13 : vector<1x64xf32> to vector<16x64xf32>
      %15 = arith.addf %12, %14 : vector<16x64xf32>
      %cst_14 = arith.constant 0.000000e+00 : f32
      %16 = vector.broadcast %cst_14 : f32 to vector<16x64xf32>
      %17 = arith.maximumf %15, %16 : vector<16x64xf32>
      %18 = arith.truncf %17 : vector<16x64xf32> to vector<16x64xbf16>
      %c0_15 = arith.constant 0 : index
      %c0_16 = arith.constant 0 : index
      %19 = vector.load %arg6[%c0_15, %c0_16] : memref<16x64xbf16, #tpu.memory_space<vmem>>, vector<16x64xbf16>
      tpu.vector_store %arg6[%c0_15, %c0_16], %18 {strides = array<i32>} : memref<16x64xbf16, #tpu.memory_space<vmem>>, vector<16x64xbf16>,
    } else {
    }
    return
  }
  func.func @transform_0(%arg0: i32, %arg1: i32, %arg2: i32) -> (i32, i32) {
    %c0_i32 = arith.constant 0 : i32
    return %arg0, %arg2 : i32, i32
  }
  func.func @transform_1(%arg0: i32, %arg1: i32, %arg2: i32) -> (i32, i32) {
    %c0_i32 = arith.constant 0 : i32
    return %arg2, %arg1 : i32, i32
  }
  func.func @transform_2(%arg0: i32, %arg1: i32, %arg2: i32) -> (i32, i32) {
    %c0_i32 = arith.constant 0 : i32
    %c0_i32_0 = arith.constant 0 : i32
    return %c0_i32, %arg1 : i32, i32
  }
  func.func @transform_3(%arg0: i32, %arg1: i32, %arg2: i32) -> (i32, i32) {
    %c0_i32 = arith.constant 0 : i32
    return %arg0, %arg1 : i32, i32
  }
}

module attributes {stable_mosaic.version = 11 : i64} {
  func.func @_linear_ln_kernel(%arg0: i32, %arg1: i32, %arg2: memref<16x32xbf16, #tpu.memory_space<vmem>>, %arg3: memref<32x32xbf16, #tpu.memory_space<vmem>>, %arg4: memref<1x32xf32, #tpu.memory_space<vmem>>, %arg5: memref<16x32xbf16, #tpu.memory_space<vmem>>, %arg6: memref<1x32xf32, #tpu.memory_space<vmem>>, %arg7: memref<1x32xf32, #tpu.memory_space<vmem>>, %arg8: memref<16x32xbf16, #tpu.memory_space<vmem>>, %arg9: memref<16x32xf32, #tpu.memory_space<vmem>>) attributes {dimension_semantics = [#tpu.dimension_semantics<parallel>, #tpu.dimension_semantics<arbitrary>], iteration_bounds = array<i64: 1, 1>, scalar_prefetch = 0 : i64, scratch_operands = 1 : i64, tpu.core_type = #tpu.core_type<tc>, window_params = [{transform_indices = @transform_0, window_bounds = array<i64: 16, 32>}, {transform_indices = @transform_1, window_bounds = array<i64: 32, 32>}, {pipeline_mode = #tpu.pipeline_mode<synchronous>, transform_indices = @transform_2, window_bounds = array<i64: 1, 32>}, {transform_indices = @transform_3, window_bounds = array<i64: 16, 32>}, {pipeline_mode = #tpu.pipeline_mode<synchronous>, transform_indices = @transform_4, window_bounds = array<i64: 1, 32>}, {pipeline_mode = #tpu.pipeline_mode<synchronous>, transform_indices = @transform_5, window_bounds = array<i64: 1, 32>}, {transform_indices = @transform_6, window_bounds = array<i64: 16, 32>}]} {
    %c0_i32 = arith.constant 0 : i32
    %0 = arith.cmpi eq, %arg1, %c0_i32 : i32
    %1 = arith.extui %0 : i1 to i32
    %c0_i32_0 = arith.constant 0 : i32
    %2 = arith.cmpi ne, %1, %c0_i32_0 : i32
    scf.if %2 {
      %cst_10 = arith.constant 0.000000e+00 : f32
      %12 = vector.broadcast %cst_10 : f32 to vector<16x32xf32>
      %c0_11 = arith.constant 0 : index
      %c0_12 = arith.constant 0 : index
      %13 = vector.load %arg9[%c0_11, %c0_12] : memref<16x32xf32, #tpu.memory_space<vmem>>, vector<16x32xf32>
      tpu.vector_store %arg9[%c0_11, %c0_12], %12 {strides = array<i32>} : memref<16x32xf32, #tpu.memory_space<vmem>>, vector<16x32xf32>,
    } else {
    }
    %c0 = arith.constant 0 : index
    %c0_1 = arith.constant 0 : index
    %3 = vector.load %arg9[%c0, %c0_1] : memref<16x32xf32, #tpu.memory_space<vmem>>, vector<16x32xf32>
    %c0_2 = arith.constant 0 : index
    %c0_3 = arith.constant 0 : index
    %4 = vector.load %arg2[%c0_2, %c0_3] : memref<16x32xbf16, #tpu.memory_space<vmem>>, vector<16x32xbf16>
    %c0_4 = arith.constant 0 : index
    %c0_5 = arith.constant 0 : index
    %5 = vector.load %arg3[%c0_4, %c0_5] : memref<32x32xbf16, #tpu.memory_space<vmem>>, vector<32x32xbf16>
    %cst = arith.constant dense<0.000000e+00> : vector<16x32xf32>
    %6 = tpu.matmul %4, %5, %cst {dimension_numbers = #tpu.dot_dimension_numbers<[1], [0], [0], [1], [0, 0, 1, 1], [], []>} : vector<16x32xbf16>, vector<32x32xbf16>, vector<16x32xf32> -> vector<16x32xf32>
    %7 = arith.addf %3, %6 : vector<16x32xf32>
    %c0_6 = arith.constant 0 : index
    %c0_7 = arith.constant 0 : index
    %8 = vector.load %arg9[%c0_6, %c0_7] : memref<16x32xf32, #tpu.memory_space<vmem>>, vector<16x32xf32>
    tpu.vector_store %arg9[%c0_6, %c0_7], %7 {strides = array<i32>} : memref<16x32xf32, #tpu.memory_space<vmem>>, vector<16x32xf32>,
    %c0_i32_8 = arith.constant 0 : i32
    %9 = arith.cmpi eq, %arg1, %c0_i32_8 : i32
    %10 = arith.extui %9 : i1 to i32
    %c0_i32_9 = arith.constant 0 : i32
    %11 = arith.cmpi ne, %10, %c0_i32_9 : i32
    scf.if %11 {
      %c0_10 = arith.constant 0 : index
      %c0_11 = arith.constant 0 : index
      %12 = vector.load %arg9[%c0_10, %c0_11] : memref<16x32xf32, #tpu.memory_space<vmem>>, vector<16x32xf32>
      %c0_12 = arith.constant 0 : index
      %c0_13 = arith.constant 0 : index
      %13 = vector.load %arg4[%c0_12, %c0_13] : memref<1x32xf32, #tpu.memory_space<vmem>>, vector<1x32xf32>
      %14 = vector.broadcast %13 : vector<1x32xf32> to vector<16x32xf32>
      %15 = arith.addf %12, %14 : vector<16x32xf32>
      %c0_14 = arith.constant 0 : index
      %c0_15 = arith.constant 0 : index
      %16 = vector.load %arg5[%c0_14, %c0_15] : memref<16x32xbf16, #tpu.memory_space<vmem>>, vector<16x32xbf16>
      %17 = arith.extf %16 : vector<16x32xbf16> to vector<16x32xf32>
      %18 = arith.addf %15, %17 : vector<16x32xf32>
      %cst_16 = arith.constant dense<0.000000e+00> : vector<16xf32>
      %19 = vector.multi_reduction <add>, %18, %cst_16 [1] : vector<16x32xf32> to vector<16xf32>
      %20 = vector.shape_cast %19 : vector<16xf32> to vector<16x1xf32>
      %cst_17 = arith.constant 3.200000e+01 : f32
      %21 = vector.broadcast %cst_17 : f32 to vector<16x1xf32>
      %22 = arith.divf %20, %21 : vector<16x1xf32>
      %23 = vector.broadcast %22 : vector<16x1xf32> to vector<16x32xf32>
      %24 = arith.subf %18, %23 : vector<16x32xf32>
      %25 = arith.mulf %24, %24 : vector<16x32xf32>
      %cst_18 = arith.constant dense<0.000000e+00> : vector<16xf32>
      %26 = vector.multi_reduction <add>, %25, %cst_18 [1] : vector<16x32xf32> to vector<16xf32>
      %27 = vector.shape_cast %26 : vector<16xf32> to vector<16x1xf32>
      %cst_19 = arith.constant 3.200000e+01 : f32
      %28 = vector.broadcast %cst_19 : f32 to vector<16x1xf32>
      %29 = arith.divf %27, %28 : vector<16x1xf32>
      %30 = vector.broadcast %22 : vector<16x1xf32> to vector<16x32xf32>
      %31 = arith.subf %18, %30 : vector<16x32xf32>
      %cst_20 = arith.constant 9.99999974E-6 : f32
      %32 = vector.broadcast %cst_20 : f32 to vector<16x1xf32>
      %33 = arith.addf %29, %32 : vector<16x1xf32>
      %34 = math.rsqrt %33 : vector<16x1xf32>
      %35 = vector.broadcast %34 : vector<16x1xf32> to vector<16x32xf32>
      %36 = arith.mulf %31, %35 : vector<16x32xf32>
      %c0_21 = arith.constant 0 : index
      %c0_22 = arith.constant 0 : index
      %37 = vector.load %arg6[%c0_21, %c0_22] : memref<1x32xf32, #tpu.memory_space<vmem>>, vector<1x32xf32>
      %38 = vector.broadcast %37 : vector<1x32xf32> to vector<16x32xf32>
      %39 = arith.mulf %36, %38 : vector<16x32xf32>
      %c0_23 = arith.constant 0 : index
      %c0_24 = arith.constant 0 : index
      %40 = vector.load %arg7[%c0_23, %c0_24] : memref<1x32xf32, #tpu.memory_space<vmem>>, vector<1x32xf32>
      %41 = vector.broadcast %40 : vector<1x32xf32> to vector<16x32xf32>
      %42 = arith.addf %39, %41 : vector<16x32xf32>
      %43 = arith.truncf %42 : vector<16x32xf32> to vector<16x32xbf16>
      %c0_25 = arith.constant 0 : index
      %c0_26 = arith.constant 0 : index
      %44 = vector.load %arg8[%c0_25, %c0_26] : memref<16x32xbf16, #tpu.memory_space<vmem>>, vector<16x32xbf16>
      tpu.vector_store %arg8[%c0_25, %c0_26], %43 {strides = array<i32>} : memref<16x32xbf16, #tpu.memory_space<vmem>>, vector<16x32xbf16>,
    } else {
    }
    return
  }
  func.func @transform_0(%arg0: i32, %arg1: i32) -> (i32, i32) {
    %c0_i32 = arith.constant 0 : i32
    return %arg0, %arg1 : i32, i32
  }
  func.func @transform_1(%arg0: i32, %arg1: i32) -> (i32, i32) {
    %c0_i32 = arith.constant 0 : i32
    %c0_i32_0 = arith.constant 0 : i32
    return %arg1, %c0_i32 : i32, i32
  }
  func.func @transform_2(%arg0: i32, %arg1: i32) -> (i32, i32) {
    %c0_i32 = arith.constant 0 : i32
    %c0_i32_0 = arith.constant 0 : i32
    %c0_i32_1 = arith.constant 0 : i32
    return %c0_i32, %c0_i32_0 : i32, i32
  }
  func.func @transform_3(%arg0: i32, %arg1: i32) -> (i32, i32) {
    %c0_i32 = arith.constant 0 : i32
    %c0_i32_0 = arith.constant 0 : i32
    return %arg0, %c0_i32 : i32, i32
  }
  func.func @transform_4(%arg0: i32, %arg1: i32) -> (i32, i32) {
    %c0_i32 = arith.constant 0 : i32
    %c0_i32_0 = arith.constant 0 : i32
    %c0_i32_1 = arith.constant 0 : i32
    return %c0_i32, %c0_i32_0 : i32, i32
  }
  func.func @transform_5(%arg0: i32, %arg1: i32) -> (i32, i32) {
    %c0_i32 = arith.constant 0 : i32
    %c0_i32_0 = arith.constant 0 : i32
    %c0_i32_1 = arith.constant 0 : i32
    return %c0_i32, %c0_i32_0 : i32, i32
  }
  func.func @transform_6(%arg0: i32, %arg1: i32) -> (i32, i32) {
    %c0_i32 = arith.constant 0 : i32
    %c0_i32_0 = arith.constant 0 : i32
    return %arg0, %c0_i32 : i32, i32
  }
}

module attributes {stable_mosaic.version = 11 : i64} {
  func.func @_mha_kernel(%arg0: i32, %arg1: i32, %arg2: memref<1x8x32xbf16, #tpu.memory_space<vmem>>, %arg3: memref<1x8x32xbf16, #tpu.memory_space<vmem>>, %arg4: memref<1x8x32xbf16, #tpu.memory_space<vmem>>, %arg5: memref<1x1x8xi32, #tpu.memory_space<vmem>>, %arg6: memref<1x8x32xbf16, #tpu.memory_space<vmem>>) attributes {dimension_semantics = [#tpu.dimension_semantics<parallel>, #tpu.dimension_semantics<parallel>], iteration_bounds = array<i64: 2, 1>, scalar_prefetch = 0 : i64, scratch_operands = 0 : i64, tpu.core_type = #tpu.core_type<tc>, window_params = [{transform_indices = @transform_0, window_bounds = array<i64: 1, 8, 32>}, {transform_indices = @transform_1, window_bounds = array<i64: 1, 8, 32>}, {transform_indices = @transform_2, window_bounds = array<i64: 1, 8, 32>}, {transform_indices = @transform_3, window_bounds = array<i64: 1, 1, 8>}, {transform_indices = @transform_4, window_bounds = array<i64: 1, 8, 32>}]} {
    %c0 = arith.constant 0 : index
    %c0_0 = arith.constant 0 : index
    %c0_1 = arith.constant 0 : index
    %0 = vector.load %arg2[%c0, %c0_0, %c0_1] : memref<1x8x32xbf16, #tpu.memory_space<vmem>>, vector<1x8x32xbf16>
    %1 = vector.shape_cast %0 : vector<1x8x32xbf16> to vector<8x32xbf16>
    %c0_2 = arith.constant 0 : index
    %c0_3 = arith.constant 0 : index
    %c0_4 = arith.constant 0 : index
    %2 = vector.load %arg3[%c0_2, %c0_3, %c0_4] : memref<1x8x32xbf16, #tpu.memory_space<vmem>>, vector<1x8x32xbf16>
    %3 = vector.shape_cast %2 : vector<1x8x32xbf16> to vector<8x32xbf16>
    %c0_5 = arith.constant 0 : index
    %c0_6 = arith.constant 0 : index
    %c0_7 = arith.constant 0 : index
    %4 = vector.load %arg4[%c0_5, %c0_6, %c0_7] : memref<1x8x32xbf16, #tpu.memory_space<vmem>>, vector<1x8x32xbf16>
    %5 = vector.shape_cast %4 : vector<1x8x32xbf16> to vector<8x32xbf16>
    %c0_8 = arith.constant 0 : index
    %c0_9 = arith.constant 0 : index
    %c0_10 = arith.constant 0 : index
    %6 = vector.load %arg5[%c0_8, %c0_9, %c0_10] : memref<1x1x8xi32, #tpu.memory_space<vmem>>, vector<1x1x8xi32>
    %7 = vector.shape_cast %6 : vector<1x1x8xi32> to vector<1x8xi32>
    %c0_i32 = arith.constant 0 : i32
    %8 = vector.broadcast %c0_i32 : i32 to vector<1x8xi32>
    %9 = arith.cmpi ne, %7, %8 : vector<1x8xi32>
    %10 = vector.shape_cast %9 : vector<1x8xi1> to vector<1x8xi1>
    %11 = vector.broadcast %10 : vector<1x8xi1> to vector<8x8xi1>
    %12 = vector.extract_strided_slice %1 {offsets = [0, 0], sizes = [8, 8], strides = [1, 1]} : vector<8x32xbf16> to vector<8x8xbf16>
    %13 = vector.extract_strided_slice %3 {offsets = [0, 0], sizes = [8, 8], strides = [1, 1]} : vector<8x32xbf16> to vector<8x8xbf16>
    %cst = arith.constant dense<0.000000e+00> : vector<8x8xf32>
    %14 = tpu.matmul %12, %13, %cst {dimension_numbers = #tpu.dot_dimension_numbers<[1], [1], [0], [0], [0, 0, 1, 0], [], []>} : vector<8x8xbf16>, vector<8x8xbf16>, vector<8x8xf32> -> vector<8x8xf32>
    %cst_11 = arith.constant 0.353553385 : f32
    %15 = vector.broadcast %cst_11 : f32 to vector<8x8xf32>
    %16 = arith.mulf %14, %15 : vector<8x8xf32>
    %cst_12 = arith.constant -1.000000e+30 : f32
    %17 = vector.broadcast %cst_12 : f32 to vector<8x8xf32>
    %18 = arith.select %11, %16, %17 : vector<8x8xi1>, vector<8x8xf32>
    %cst_13 = arith.constant dense<0xFF800000> : vector<8xf32>
    %19 = vector.multi_reduction <maximumf>, %18, %cst_13 [1] : vector<8x8xf32> to vector<8xf32>
    %20 = vector.shape_cast %19 : vector<8xf32> to vector<8x1xf32>
    %21 = vector.broadcast %20 : vector<8x1xf32> to vector<8x8xf32>
    %22 = arith.subf %18, %21 : vector<8x8xf32>
    %23 = math.exp %22 : vector<8x8xf32>
    %cst_14 = arith.constant dense<0.000000e+00> : vector<8xf32>
    %24 = vector.multi_reduction <add>, %23, %cst_14 [1] : vector<8x8xf32> to vector<8xf32>
    %25 = vector.shape_cast %24 : vector<8xf32> to vector<8x1xf32>
    %26 = tpu.reciprocal %25 {approx = true} : vector<8x1xf32> -> vector<8x1xf32>
    %27 = vector.broadcast %26 : vector<8x1xf32> to vector<8x8xf32>
    %28 = arith.mulf %23, %27 : vector<8x8xf32>
    %29 = arith.truncf %28 : vector<8x8xf32> to vector<8x8xbf16>
    %30 = vector.extract_strided_slice %5 {offsets = [0, 0], sizes = [8, 8], strides = [1, 1]} : vector<8x32xbf16> to vector<8x8xbf16>
    %cst_15 = arith.constant dense<0.000000e+00> : vector<8x8xf32>
    %31 = tpu.matmul %29, %30, %cst_15 {dimension_numbers = #tpu.dot_dimension_numbers<[1], [0], [0], [1], [0, 0, 1, 1], [], []>} : vector<8x8xbf16>, vector<8x8xbf16>, vector<8x8xf32> -> vector<8x8xf32>
    %32 = arith.truncf %31 : vector<8x8xf32> to vector<8x8xbf16>
    %c0_16 = arith.constant 0 : index
    %c0_17 = arith.constant 0 : index
    %c0_18 = arith.constant 0 : index
    %33 = vector.load %arg6[%c0_16, %c0_17, %c0_18] : memref<1x8x32xbf16, #tpu.memory_space<vmem>>, vector<1x8x8xbf16>
    %34 = vector.shape_cast %33 : vector<1x8x8xbf16> to vector<8x8xbf16>
    %35 = vector.shape_cast %32 : vector<8x8xbf16> to vector<1x8x8xbf16>
    tpu.vector_store %arg6[%c0_16, %c0_17, %c0_18], %35 {strides = array<i32>} : memref<1x8x32xbf16, #tpu.memory_space<vmem>>, vector<1x8x8xbf16>,
    %36 = vector.extract_strided_slice %1 {offsets = [0, 8], sizes = [8, 8], strides = [1, 1]} : vector<8x32xbf16> to vector<8x8xbf16>
    %37 = vector.extract_strided_slice %3 {offsets = [0, 8], sizes = [8, 8], strides = [1, 1]} : vector<8x32xbf16> to vector<8x8xbf16>
    %cst_19 = arith.constant dense<0.000000e+00> : vector<8x8xf32>
    %38 = tpu.matmul %36, %37, %cst_19 {dimension_numbers = #tpu.dot_dimension_numbers<[1], [1], [0], [0], [0, 0, 1, 0], [], []>} : vector<8x8xbf16>, vector<8x8xbf16>, vector<8x8xf32> -> vector<8x8xf32>
    %cst_20 = arith.constant 0.353553385 : f32
    %39 = vector.broadcast %cst_20 : f32 to vector<8x8xf32>
    %40 = arith.mulf %38, %39 : vector<8x8xf32>
    %cst_21 = arith.constant -1.000000e+30 : f32
    %41 = vector.broadcast %cst_21 : f32 to vector<8x8xf32>
    %42 = arith.select %11, %40, %41 : vector<8x8xi1>, vector<8x8xf32>
    %cst_22 = arith.constant dense<0xFF800000> : vector<8xf32>
    %43 = vector.multi_reduction <maximumf>, %42, %cst_22 [1] : vector<8x8xf32> to vector<8xf32>
    %44 = vector.shape_cast %43 : vector<8xf32> to vector<8x1xf32>
    %45 = vector.broadcast %44 : vector<8x1xf32> to vector<8x8xf32>
    %46 = arith.subf %42, %45 : vector<8x8xf32>
    %47 = math.exp %46 : vector<8x8xf32>
    %cst_23 = arith.constant dense<0.000000e+00> : vector<8xf32>
    %48 = vector.multi_reduction <add>, %47, %cst_23 [1] : vector<8x8xf32> to vector<8xf32>
    %49 = vector.shape_cast %48 : vector<8xf32> to vector<8x1xf32>
    %50 = tpu.reciprocal %49 {approx = true} : vector<8x1xf32> -> vector<8x1xf32>
    %51 = vector.broadcast %50 : vector<8x1xf32> to vector<8x8xf32>
    %52 = arith.mulf %47, %51 : vector<8x8xf32>
    %53 = arith.truncf %52 : vector<8x8xf32> to vector<8x8xbf16>
    %54 = vector.extract_strided_slice %5 {offsets = [0, 8], sizes = [8, 8], strides = [1, 1]} : vector<8x32xbf16> to vector<8x8xbf16>
    %cst_24 = arith.constant dense<0.000000e+00> : vector<8x8xf32>
    %55 = tpu.matmul %53, %54, %cst_24 {dimension_numbers = #tpu.dot_dimension_numbers<[1], [0], [0], [1], [0, 0, 1, 1], [], []>} : vector<8x8xbf16>, vector<8x8xbf16>, vector<8x8xf32> -> vector<8x8xf32>
    %56 = arith.truncf %55 : vector<8x8xf32> to vector<8x8xbf16>
    %c0_25 = arith.constant 0 : index
    %c0_26 = arith.constant 0 : index
    %c8 = arith.constant 8 : index
    %57 = vector.load %arg6[%c0_25, %c0_26, %c8] : memref<1x8x32xbf16, #tpu.memory_space<vmem>>, vector<1x8x8xbf16>
    %58 = vector.shape_cast %57 : vector<1x8x8xbf16> to vector<8x8xbf16>
    %59 = vector.shape_cast %56 : vector<8x8xbf16> to vector<1x8x8xbf16>
    tpu.vector_store %arg6[%c0_25, %c0_26, %c8], %59 {strides = array<i32>} : memref<1x8x32xbf16, #tpu.memory_space<vmem>>, vector<1x8x8xbf16>,
    %60 = vector.extract_strided_slice %1 {offsets = [0, 16], sizes = [8, 8], strides = [1, 1]} : vector<8x32xbf16> to vector<8x8xbf16>
    %61 = vector.extract_strided_slice %3 {offsets = [0, 16], sizes = [8, 8], strides = [1, 1]} : vector<8x32xbf16> to vector<8x8xbf16>
    %cst_27 = arith.constant dense<0.000000e+00> : vector<8x8xf32>
    %62 = tpu.matmul %60, %61, %cst_27 {dimension_numbers = #tpu.dot_dimension_numbers<[1], [1], [0], [0], [0, 0, 1, 0], [], []>} : vector<8x8xbf16>, vector<8x8xbf16>, vector<8x8xf32> -> vector<8x8xf32>
    %cst_28 = arith.constant 0.353553385 : f32
    %63 = vector.broadcast %cst_28 : f32 to vector<8x8xf32>
    %64 = arith.mulf %62, %63 : vector<8x8xf32>
    %cst_29 = arith.constant -1.000000e+30 : f32
    %65 = vector.broadcast %cst_29 : f32 to vector<8x8xf32>
    %66 = arith.select %11, %64, %65 : vector<8x8xi1>, vector<8x8xf32>
    %cst_30 = arith.constant dense<0xFF800000> : vector<8xf32>
    %67 = vector.multi_reduction <maximumf>, %66, %cst_30 [1] : vector<8x8xf32> to vector<8xf32>
    %68 = vector.shape_cast %67 : vector<8xf32> to vector<8x1xf32>
    %69 = vector.broadcast %68 : vector<8x1xf32> to vector<8x8xf32>
    %70 = arith.subf %66, %69 : vector<8x8xf32>
    %71 = math.exp %70 : vector<8x8xf32>
    %cst_31 = arith.constant dense<0.000000e+00> : vector<8xf32>
    %72 = vector.multi_reduction <add>, %71, %cst_31 [1] : vector<8x8xf32> to vector<8xf32>
    %73 = vector.shape_cast %72 : vector<8xf32> to vector<8x1xf32>
    %74 = tpu.reciprocal %73 {approx = true} : vector<8x1xf32> -> vector<8x1xf32>
    %75 = vector.broadcast %74 : vector<8x1xf32> to vector<8x8xf32>
    %76 = arith.mulf %71, %75 : vector<8x8xf32>
    %77 = arith.truncf %76 : vector<8x8xf32> to vector<8x8xbf16>
    %78 = vector.extract_strided_slice %5 {offsets = [0, 16], sizes = [8, 8], strides = [1, 1]} : vector<8x32xbf16> to vector<8x8xbf16>
    %cst_32 = arith.constant dense<0.000000e+00> : vector<8x8xf32>
    %79 = tpu.matmul %77, %78, %cst_32 {dimension_numbers = #tpu.dot_dimension_numbers<[1], [0], [0], [1], [0, 0, 1, 1], [], []>} : vector<8x8xbf16>, vector<8x8xbf16>, vector<8x8xf32> -> vector<8x8xf32>
    %80 = arith.truncf %79 : vector<8x8xf32> to vector<8x8xbf16>
    %c0_33 = arith.constant 0 : index
    %c0_34 = arith.constant 0 : index
    %c16 = arith.constant 16 : index
    %81 = vector.load %arg6[%c0_33, %c0_34, %c16] : memref<1x8x32xbf16, #tpu.memory_space<vmem>>, vector<1x8x8xbf16>
    %82 = vector.shape_cast %81 : vector<1x8x8xbf16> to vector<8x8xbf16>
    %83 = vector.shape_cast %80 : vector<8x8xbf16> to vector<1x8x8xbf16>
    tpu.vector_store %arg6[%c0_33, %c0_34, %c16], %83 {strides = array<i32>} : memref<1x8x32xbf16, #tpu.memory_space<vmem>>, vector<1x8x8xbf16>,
    %84 = vector.extract_strided_slice %1 {offsets = [0, 24], sizes = [8, 8], strides = [1, 1]} : vector<8x32xbf16> to vector<8x8xbf16>
    %85 = vector.extract_strided_slice %3 {offsets = [0, 24], sizes = [8, 8], strides = [1, 1]} : vector<8x32xbf16> to vector<8x8xbf16>
    %cst_35 = arith.constant dense<0.000000e+00> : vector<8x8xf32>
    %86 = tpu.matmul %84, %85, %cst_35 {dimension_numbers = #tpu.dot_dimension_numbers<[1], [1], [0], [0], [0, 0, 1, 0], [], []>} : vector<8x8xbf16>, vector<8x8xbf16>, vector<8x8xf32> -> vector<8x8xf32>
    %cst_36 = arith.constant 0.353553385 : f32
    %87 = vector.broadcast %cst_36 : f32 to vector<8x8xf32>
    %88 = arith.mulf %86, %87 : vector<8x8xf32>
    %cst_37 = arith.constant -1.000000e+30 : f32
    %89 = vector.broadcast %cst_37 : f32 to vector<8x8xf32>
    %90 = arith.select %11, %88, %89 : vector<8x8xi1>, vector<8x8xf32>
    %cst_38 = arith.constant dense<0xFF800000> : vector<8xf32>
    %91 = vector.multi_reduction <maximumf>, %90, %cst_38 [1] : vector<8x8xf32> to vector<8xf32>
    %92 = vector.shape_cast %91 : vector<8xf32> to vector<8x1xf32>
    %93 = vector.broadcast %92 : vector<8x1xf32> to vector<8x8xf32>
    %94 = arith.subf %90, %93 : vector<8x8xf32>
    %95 = math.exp %94 : vector<8x8xf32>
    %cst_39 = arith.constant dense<0.000000e+00> : vector<8xf32>
    %96 = vector.multi_reduction <add>, %95, %cst_39 [1] : vector<8x8xf32> to vector<8xf32>
    %97 = vector.shape_cast %96 : vector<8xf32> to vector<8x1xf32>
    %98 = tpu.reciprocal %97 {approx = true} : vector<8x1xf32> -> vector<8x1xf32>
    %99 = vector.broadcast %98 : vector<8x1xf32> to vector<8x8xf32>
    %100 = arith.mulf %95, %99 : vector<8x8xf32>
    %101 = arith.truncf %100 : vector<8x8xf32> to vector<8x8xbf16>
    %102 = vector.extract_strided_slice %5 {offsets = [0, 24], sizes = [8, 8], strides = [1, 1]} : vector<8x32xbf16> to vector<8x8xbf16>
    %cst_40 = arith.constant dense<0.000000e+00> : vector<8x8xf32>
    %103 = tpu.matmul %101, %102, %cst_40 {dimension_numbers = #tpu.dot_dimension_numbers<[1], [0], [0], [1], [0, 0, 1, 1], [], []>} : vector<8x8xbf16>, vector<8x8xbf16>, vector<8x8xf32> -> vector<8x8xf32>
    %104 = arith.truncf %103 : vector<8x8xf32> to vector<8x8xbf16>
    %c0_41 = arith.constant 0 : index
    %c0_42 = arith.constant 0 : index
    %c24 = arith.constant 24 : index
    %105 = vector.load %arg6[%c0_41, %c0_42, %c24] : memref<1x8x32xbf16, #tpu.memory_space<vmem>>, vector<1x8x8xbf16>
    %106 = vector.shape_cast %105 : vector<1x8x8xbf16> to vector<8x8xbf16>
    %107 = vector.shape_cast %104 : vector<8x8xbf16> to vector<1x8x8xbf16>
    tpu.vector_store %arg6[%c0_41, %c0_42, %c24], %107 {strides = array<i32>} : memref<1x8x32xbf16, #tpu.memory_space<vmem>>, vector<1x8x8xbf16>,
    return
  }
  func.func @transform_0(%arg0: i32, %arg1: i32) -> (i32, i32, i32) {
    %c0_i32 = arith.constant 0 : i32
    %c0_i32_0 = arith.constant 0 : i32
    return %arg0, %arg1, %c0_i32 : i32, i32, i32
  }
  func.func @transform_1(%arg0: i32, %arg1: i32) -> (i32, i32, i32) {
    %c0_i32 = arith.constant 0 : i32
    %c0_i32_0 = arith.constant 0 : i32
    %c0_i32_1 = arith.constant 0 : i32
    return %arg0, %c0_i32, %c0_i32_0 : i32, i32, i32
  }
  func.func @transform_2(%arg0: i32, %arg1: i32) -> (i32, i32, i32) {
    %c0_i32 = arith.constant 0 : i32
    %c0_i32_0 = arith.constant 0 : i32
    %c0_i32_1 = arith.constant 0 : i32
    return %arg0, %c0_i32, %c0_i32_0 : i32, i32, i32
  }
  func.func @transform_3(%arg0: i32, %arg1: i32) -> (i32, i32, i32) {
    %c0_i32 = arith.constant 0 : i32
    %c0_i32_0 = arith.constant 0 : i32
    %c0_i32_1 = arith.constant 0 : i32
    return %arg0, %c0_i32, %c0_i32_0 : i32, i32, i32
  }
  func.func @transform_4(%arg0: i32, %arg1: i32) -> (i32, i32, i32) {
    %c0_i32 = arith.constant 0 : i32
    %c0_i32_0 = arith.constant 0 : i32
    return %arg0, %arg1, %c0_i32 : i32, i32, i32
  }
}

module attributes {stable_mosaic.version = 11 : i64} {
  func.func @_linear_kernel(%arg0: i32, %arg1: i32, %arg2: i32, %arg3: memref<16x32xbf16, #tpu.memory_space<vmem>>, %arg4: memref<32x64xbf16, #tpu.memory_space<vmem>>, %arg5: memref<1x64xf32, #tpu.memory_space<vmem>>, %arg6: memref<16x64xbf16, #tpu.memory_space<vmem>>, %arg7: memref<16x64xf32, #tpu.memory_space<vmem>>) attributes {dimension_semantics = [#tpu.dimension_semantics<parallel>, #tpu.dimension_semantics<parallel>, #tpu.dimension_semantics<arbitrary>], iteration_bounds = array<i64: 1, 1, 1>, scalar_prefetch = 0 : i64, scratch_operands = 1 : i64, tpu.core_type = #tpu.core_type<tc>, window_params = [{transform_indices = @transform_0, window_bounds = array<i64: 16, 32>}, {transform_indices = @transform_1, window_bounds = array<i64: 32, 64>}, {transform_indices = @transform_2, window_bounds = array<i64: 1, 64>}, {transform_indices = @transform_3, window_bounds = array<i64: 16, 64>}]} {
    %c0_i32 = arith.constant 0 : i32
    %0 = arith.cmpi eq, %arg2, %c0_i32 : i32
    %1 = arith.extui %0 : i1 to i32
    %c0_i32_0 = arith.constant 0 : i32
    %2 = arith.cmpi ne, %1, %c0_i32_0 : i32
    scf.if %2 {
      %cst_10 = arith.constant 0.000000e+00 : f32
      %12 = vector.broadcast %cst_10 : f32 to vector<16x64xf32>
      %c0_11 = arith.constant 0 : index
      %c0_12 = arith.constant 0 : index
      %13 = vector.load %arg7[%c0_11, %c0_12] : memref<16x64xf32, #tpu.memory_space<vmem>>, vector<16x64xf32>
      tpu.vector_store %arg7[%c0_11, %c0_12], %12 {strides = array<i32>} : memref<16x64xf32, #tpu.memory_space<vmem>>, vector<16x64xf32>,
    } else {
    }
    %c0 = arith.constant 0 : index
    %c0_1 = arith.constant 0 : index
    %3 = vector.load %arg7[%c0, %c0_1] : memref<16x64xf32, #tpu.memory_space<vmem>>, vector<16x64xf32>
    %c0_2 = arith.constant 0 : index
    %c0_3 = arith.constant 0 : index
    %4 = vector.load %arg3[%c0_2, %c0_3] : memref<16x32xbf16, #tpu.memory_space<vmem>>, vector<16x32xbf16>
    %c0_4 = arith.constant 0 : index
    %c0_5 = arith.constant 0 : index
    %5 = vector.load %arg4[%c0_4, %c0_5] : memref<32x64xbf16, #tpu.memory_space<vmem>>, vector<32x64xbf16>
    %cst = arith.constant dense<0.000000e+00> : vector<16x64xf32>
    %6 = tpu.matmul %4, %5, %cst {dimension_numbers = #tpu.dot_dimension_numbers<[1], [0], [0], [1], [0, 0, 1, 1], [], []>} : vector<16x32xbf16>, vector<32x64xbf16>, vector<16x64xf32> -> vector<16x64xf32>
    %7 = arith.addf %3, %6 : vector<16x64xf32>
    %c0_6 = arith.constant 0 : index
    %c0_7 = arith.constant 0 : index
    %8 = vector.load %arg7[%c0_6, %c0_7] : memref<16x64xf32, #tpu.memory_space<vmem>>, vector<16x64xf32>
    tpu.vector_store %arg7[%c0_6, %c0_7], %7 {strides = array<i32>} : memref<16x64xf32, #tpu.memory_space<vmem>>, vector<16x64xf32>,
    %c0_i32_8 = arith.constant 0 : i32
    %9 = arith.cmpi eq, %arg2, %c0_i32_8 : i32
    %10 = arith.extui %9 : i1 to i32
    %c0_i32_9 = arith.constant 0 : i32
    %11 = arith.cmpi ne, %10, %c0_i32_9 : i32
    scf.if %11 {
      %c0_10 = arith.constant 0 : index
      %c0_11 = arith.constant 0 : index
      %12 = vector.load %arg7[%c0_10, %c0_11] : memref<16x64xf32, #tpu.memory_space<vmem>>, vector<16x64xf32>
      %c0_12 = arith.constant 0 : index
      %c0_13 = arith.constant 0 : index
      %13 = vector.load %arg5[%c0_12, %c0_13] : memref<1x64xf32, #tpu.memory_space<vmem>>, vector<1x64xf32>
      %14 = vector.broadcast %13 : vector<1x64xf32> to vector<16x64xf32>
      %15 = arith.addf %12, %14 : vector<16x64xf32>
      %16 = arith.truncf %15 : vector<16x64xf32> to vector<16x64xbf16>
      %c0_14 = arith.constant 0 : index
      %c0_15 = arith.constant 0 : index
      %17 = vector.load %arg6[%c0_14, %c0_15] : memref<16x64xbf16, #tpu.memory_space<vmem>>, vector<16x64xbf16>
      tpu.vector_store %arg6[%c0_14, %c0_15], %16 {strides = array<i32>} : memref<16x64xbf16, #tpu.memory_space<vmem>>, vector<16x64xbf16>,
    } else {
    }
    return
  }
  func.func @transform_0(%arg0: i32, %arg1: i32, %arg2: i32) -> (i32, i32) {
    %c0_i32 = arith.constant 0 : i32
    return %arg0, %arg2 : i32, i32
  }
  func.func @transform_1(%arg0: i32, %arg1: i32, %arg2: i32) -> (i32, i32) {
    %c0_i32 = arith.constant 0 : i32
    return %arg2, %arg1 : i32, i32
  }
  func.func @transform_2(%arg0: i32, %arg1: i32, %arg2: i32) -> (i32, i32) {
    %c0_i32 = arith.constant 0 : i32
    %c0_i32_0 = arith.constant 0 : i32
    return %c0_i32, %arg1 : i32, i32
  }
  func.func @transform_3(%arg0: i32, %arg1: i32, %arg2: i32) -> (i32, i32) {
    %c0_i32 = arith.constant 0 : i32
    return %arg0, %arg1 : i32, i32
  }
}

module attributes {stable_mosaic.version = 11 : i64} {
  func.func @_linear_ln_kernel(%arg0: i32, %arg1: i32, %arg2: memref<16x64xbf16, #tpu.memory_space<vmem>>, %arg3: memref<64x32xbf16, #tpu.memory_space<vmem>>, %arg4: memref<1x32xf32, #tpu.memory_space<vmem>>, %arg5: memref<16x32xbf16, #tpu.memory_space<vmem>>, %arg6: memref<1x32xf32, #tpu.memory_space<vmem>>, %arg7: memref<1x32xf32, #tpu.memory_space<vmem>>, %arg8: memref<16x32xbf16, #tpu.memory_space<vmem>>, %arg9: memref<16x32xf32, #tpu.memory_space<vmem>>) attributes {dimension_semantics = [#tpu.dimension_semantics<parallel>, #tpu.dimension_semantics<arbitrary>], iteration_bounds = array<i64: 1, 1>, scalar_prefetch = 0 : i64, scratch_operands = 1 : i64, tpu.core_type = #tpu.core_type<tc>, window_params = [{transform_indices = @transform_0, window_bounds = array<i64: 16, 64>}, {transform_indices = @transform_1, window_bounds = array<i64: 64, 32>}, {pipeline_mode = #tpu.pipeline_mode<synchronous>, transform_indices = @transform_2, window_bounds = array<i64: 1, 32>}, {transform_indices = @transform_3, window_bounds = array<i64: 16, 32>}, {pipeline_mode = #tpu.pipeline_mode<synchronous>, transform_indices = @transform_4, window_bounds = array<i64: 1, 32>}, {pipeline_mode = #tpu.pipeline_mode<synchronous>, transform_indices = @transform_5, window_bounds = array<i64: 1, 32>}, {transform_indices = @transform_6, window_bounds = array<i64: 16, 32>}]} {
    %c0_i32 = arith.constant 0 : i32
    %0 = arith.cmpi eq, %arg1, %c0_i32 : i32
    %1 = arith.extui %0 : i1 to i32
    %c0_i32_0 = arith.constant 0 : i32
    %2 = arith.cmpi ne, %1, %c0_i32_0 : i32
    scf.if %2 {
      %cst_10 = arith.constant 0.000000e+00 : f32
      %12 = vector.broadcast %cst_10 : f32 to vector<16x32xf32>
      %c0_11 = arith.constant 0 : index
      %c0_12 = arith.constant 0 : index
      %13 = vector.load %arg9[%c0_11, %c0_12] : memref<16x32xf32, #tpu.memory_space<vmem>>, vector<16x32xf32>
      tpu.vector_store %arg9[%c0_11, %c0_12], %12 {strides = array<i32>} : memref<16x32xf32, #tpu.memory_space<vmem>>, vector<16x32xf32>,
    } else {
    }
    %c0 = arith.constant 0 : index
    %c0_1 = arith.constant 0 : index
    %3 = vector.load %arg9[%c0, %c0_1] : memref<16x32xf32, #tpu.memory_space<vmem>>, vector<16x32xf32>
    %c0_2 = arith.constant 0 : index
    %c0_3 = arith.constant 0 : index
    %4 = vector.load %arg2[%c0_2, %c0_3] : memref<16x64xbf16, #tpu.memory_space<vmem>>, vector<16x64xbf16>
    %c0_4 = arith.constant 0 : index
    %c0_5 = arith.constant 0 : index
    %5 = vector.load %arg3[%c0_4, %c0_5] : memref<64x32xbf16, #tpu.memory_space<vmem>>, vector<64x32xbf16>
    %cst = arith.constant dense<0.000000e+00> : vector<16x32xf32>
    %6 = tpu.matmul %4, %5, %cst {dimension_numbers = #tpu.dot_dimension_numbers<[1], [0], [0], [1], [0, 0, 1, 1], [], []>} : vector<16x64xbf16>, vector<64x32xbf16>, vector<16x32xf32> -> vector<16x32xf32>
    %7 = arith.addf %3, %6 : vector<16x32xf32>
    %c0_6 = arith.constant 0 : index
    %c0_7 = arith.constant 0 : index
    %8 = vector.load %arg9[%c0_6, %c0_7] : memref<16x32xf32, #tpu.memory_space<vmem>>, vector<16x32xf32>
    tpu.vector_store %arg9[%c0_6, %c0_7], %7 {strides = array<i32>} : memref<16x32xf32, #tpu.memory_space<vmem>>, vector<16x32xf32>,
    %c0_i32_8 = arith.constant 0 : i32
    %9 = arith.cmpi eq, %arg1, %c0_i32_8 : i32
    %10 = arith.extui %9 : i1 to i32
    %c0_i32_9 = arith.constant 0 : i32
    %11 = arith.cmpi ne, %10, %c0_i32_9 : i32
    scf.if %11 {
      %c0_10 = arith.constant 0 : index
      %c0_11 = arith.constant 0 : index
      %12 = vector.load %arg9[%c0_10, %c0_11] : memref<16x32xf32, #tpu.memory_space<vmem>>, vector<16x32xf32>
      %c0_12 = arith.constant 0 : index
      %c0_13 = arith.constant 0 : index
      %13 = vector.load %arg4[%c0_12, %c0_13] : memref<1x32xf32, #tpu.memory_space<vmem>>, vector<1x32xf32>
      %14 = vector.broadcast %13 : vector<1x32xf32> to vector<16x32xf32>
      %15 = arith.addf %12, %14 : vector<16x32xf32>
      %c0_14 = arith.constant 0 : index
      %c0_15 = arith.constant 0 : index
      %16 = vector.load %arg5[%c0_14, %c0_15] : memref<16x32xbf16, #tpu.memory_space<vmem>>, vector<16x32xbf16>
      %17 = arith.extf %16 : vector<16x32xbf16> to vector<16x32xf32>
      %18 = arith.addf %15, %17 : vector<16x32xf32>
      %cst_16 = arith.constant dense<0.000000e+00> : vector<16xf32>
      %19 = vector.multi_reduction <add>, %18, %cst_16 [1] : vector<16x32xf32> to vector<16xf32>
      %20 = vector.shape_cast %19 : vector<16xf32> to vector<16x1xf32>
      %cst_17 = arith.constant 3.200000e+01 : f32
      %21 = vector.broadcast %cst_17 : f32 to vector<16x1xf32>
      %22 = arith.divf %20, %21 : vector<16x1xf32>
      %23 = vector.broadcast %22 : vector<16x1xf32> to vector<16x32xf32>
      %24 = arith.subf %18, %23 : vector<16x32xf32>
      %25 = arith.mulf %24, %24 : vector<16x32xf32>
      %cst_18 = arith.constant dense<0.000000e+00> : vector<16xf32>
      %26 = vector.multi_reduction <add>, %25, %cst_18 [1] : vector<16x32xf32> to vector<16xf32>
      %27 = vector.shape_cast %26 : vector<16xf32> to vector<16x1xf32>
      %cst_19 = arith.constant 3.200000e+01 : f32
      %28 = vector.broadcast %cst_19 : f32 to vector<16x1xf32>
      %29 = arith.divf %27, %28 : vector<16x1xf32>
      %30 = vector.broadcast %22 : vector<16x1xf32> to vector<16x32xf32>
      %31 = arith.subf %18, %30 : vector<16x32xf32>
      %cst_20 = arith.constant 9.99999974E-6 : f32
      %32 = vector.broadcast %cst_20 : f32 to vector<16x1xf32>
      %33 = arith.addf %29, %32 : vector<16x1xf32>
      %34 = math.rsqrt %33 : vector<16x1xf32>
      %35 = vector.broadcast %34 : vector<16x1xf32> to vector<16x32xf32>
      %36 = arith.mulf %31, %35 : vector<16x32xf32>
      %c0_21 = arith.constant 0 : index
      %c0_22 = arith.constant 0 : index
      %37 = vector.load %arg6[%c0_21, %c0_22] : memref<1x32xf32, #tpu.memory_space<vmem>>, vector<1x32xf32>
      %38 = vector.broadcast %37 : vector<1x32xf32> to vector<16x32xf32>
      %39 = arith.mulf %36, %38 : vector<16x32xf32>
      %c0_23 = arith.constant 0 : index
      %c0_24 = arith.constant 0 : index
      %40 = vector.load %arg7[%c0_23, %c0_24] : memref<1x32xf32, #tpu.memory_space<vmem>>, vector<1x32xf32>
      %41 = vector.broadcast %40 : vector<1x32xf32> to vector<16x32xf32>
      %42 = arith.addf %39, %41 : vector<16x32xf32>
      %43 = arith.truncf %42 : vector<16x32xf32> to vector<16x32xbf16>
      %c0_25 = arith.constant 0 : index
      %c0_26 = arith.constant 0 : index
      %44 = vector.load %arg8[%c0_25, %c0_26] : memref<16x32xbf16, #tpu.memory_space<vmem>>, vector<16x32xbf16>
      tpu.vector_store %arg8[%c0_25, %c0_26], %43 {strides = array<i32>} : memref<16x32xbf16, #tpu.memory_space<vmem>>, vector<16x32xbf16>,
    } else {
    }
    return
  }
  func.func @transform_0(%arg0: i32, %arg1: i32) -> (i32, i32) {
    %c0_i32 = arith.constant 0 : i32
    return %arg0, %arg1 : i32, i32
  }
  func.func @transform_1(%arg0: i32, %arg1: i32) -> (i32, i32) {
    %c0_i32 = arith.constant 0 : i32
    %c0_i32_0 = arith.constant 0 : i32
    return %arg1, %c0_i32 : i32, i32
  }
  func.func @transform_2(%arg0: i32, %arg1: i32) -> (i32, i32) {
    %c0_i32 = arith.constant 0 : i32
    %c0_i32_0 = arith.constant 0 : i32
    %c0_i32_1 = arith.constant 0 : i32
    return %c0_i32, %c0_i32_0 : i32, i32
  }
  func.func @transform_3(%arg0: i32, %arg1: i32) -> (i32, i32) {
    %c0_i32 = arith.constant 0 : i32
    %c0_i32_0 = arith.constant 0 : i32
    return %arg0, %c0_i32 : i32, i32
  }
  func.func @transform_4(%arg0: i32, %arg1: i32) -> (i32, i32) {
    %c0_i32 = arith.constant 0 : i32
    %c0_i32_0 = arith.constant 0 : i32
    %c0_i32_1 = arith.constant 0 : i32
    return %c0_i32, %c0_i32_0 : i32, i32
  }
  func.func @transform_5(%arg0: i32, %arg1: i32) -> (i32, i32) {
    %c0_i32 = arith.constant 0 : i32
    %c0_i32_0 = arith.constant 0 : i32
    %c0_i32_1 = arith.constant 0 : i32
    return %c0_i32, %c0_i32_0 : i32, i32
  }
  func.func @transform_6(%arg0: i32, %arg1: i32) -> (i32, i32) {
    %c0_i32 = arith.constant 0 : i32
    %c0_i32_0 = arith.constant 0 : i32
    return %arg0, %c0_i32 : i32, i32
  }
}

module attributes {stable_mosaic.version = 11 : i64} {
  func.func @_mha_kernel(%arg0: i32, %arg1: i32, %arg2: memref<1x8x32xbf16, #tpu.memory_space<vmem>>, %arg3: memref<1x8x32xbf16, #tpu.memory_space<vmem>>, %arg4: memref<1x8x32xbf16, #tpu.memory_space<vmem>>, %arg5: memref<1x1x8xi32, #tpu.memory_space<vmem>>, %arg6: memref<1x8x32xbf16, #tpu.memory_space<vmem>>) attributes {dimension_semantics = [#tpu.dimension_semantics<parallel>, #tpu.dimension_semantics<parallel>], iteration_bounds = array<i64: 2, 1>, scalar_prefetch = 0 : i64, scratch_operands = 0 : i64, tpu.core_type = #tpu.core_type<tc>, window_params = [{transform_indices = @transform_0, window_bounds = array<i64: 1, 8, 32>}, {transform_indices = @transform_1, window_bounds = array<i64: 1, 8, 32>}, {transform_indices = @transform_2, window_bounds = array<i64: 1, 8, 32>}, {transform_indices = @transform_3, window_bounds = array<i64: 1, 1, 8>}, {transform_indices = @transform_4, window_bounds = array<i64: 1, 8, 32>}]} {
    %c0 = arith.constant 0 : index
    %c0_0 = arith.constant 0 : index
    %c0_1 = arith.constant 0 : index
    %0 = vector.load %arg2[%c0, %c0_0, %c0_1] : memref<1x8x32xbf16, #tpu.memory_space<vmem>>, vector<1x8x32xbf16>
    %1 = vector.shape_cast %0 : vector<1x8x32xbf16> to vector<8x32xbf16>
    %c0_2 = arith.constant 0 : index
    %c0_3 = arith.constant 0 : index
    %c0_4 = arith.constant 0 : index
    %2 = vector.load %arg3[%c0_2, %c0_3, %c0_4] : memref<1x8x32xbf16, #tpu.memory_space<vmem>>, vector<1x8x32xbf16>
    %3 = vector.shape_cast %2 : vector<1x8x32xbf16> to vector<8x32xbf16>
    %c0_5 = arith.constant 0 : index
    %c0_6 = arith.constant 0 : index
    %c0_7 = arith.constant 0 : index
    %4 = vector.load %arg4[%c0_5, %c0_6, %c0_7] : memref<1x8x32xbf16, #tpu.memory_space<vmem>>, vector<1x8x32xbf16>
    %5 = vector.shape_cast %4 : vector<1x8x32xbf16> to vector<8x32xbf16>
    %c0_8 = arith.constant 0 : index
    %c0_9 = arith.constant 0 : index
    %c0_10 = arith.constant 0 : index
    %6 = vector.load %arg5[%c0_8, %c0_9, %c0_10] : memref<1x1x8xi32, #tpu.memory_space<vmem>>, vector<1x1x8xi32>
    %7 = vector.shape_cast %6 : vector<1x1x8xi32> to vector<1x8xi32>
    %c0_i32 = arith.constant 0 : i32
    %8 = vector.broadcast %c0_i32 : i32 to vector<1x8xi32>
    %9 = arith.cmpi ne, %7, %8 : vector<1x8xi32>
    %10 = vector.shape_cast %9 : vector<1x8xi1> to vector<1x8xi1>
    %11 = vector.broadcast %10 : vector<1x8xi1> to vector<8x8xi1>
    %c8_i32 = arith.constant 8 : i32
    %12 = arith.muli %arg1, %c8_i32 : i32
    %13 = tpu.iota {dimensions = array<i32: 0>} : vector<8x8xi32>
    %14 = vector.broadcast %12 : i32 to vector<8x8xi32>
    %15 = arith.addi %14, %13 : vector<8x8xi32>
    %16 = tpu.iota {dimensions = array<i32: 1>} : vector<8x8xi32>
    %17 = arith.cmpi sle, %16, %15 : vector<8x8xi32>
    %18 = arith.andi %11, %17 : vector<8x8xi1>
    %19 = vector.extract_strided_slice %1 {offsets = [0, 0], sizes = [8, 8], strides = [1, 1]} : vector<8x32xbf16> to vector<8x8xbf16>
    %20 = vector.extract_strided_slice %3 {offsets = [0, 0], sizes = [8, 8], strides = [1, 1]} : vector<8x32xbf16> to vector<8x8xbf16>
    %cst = arith.constant dense<0.000000e+00> : vector<8x8xf32>
    %21 = tpu.matmul %19, %20, %cst {dimension_numbers = #tpu.dot_dimension_numbers<[1], [1], [0], [0], [0, 0, 1, 0], [], []>} : vector<8x8xbf16>, vector<8x8xbf16>, vector<8x8xf32> -> vector<8x8xf32>
    %cst_11 = arith.constant 0.353553385 : f32
    %22 = vector.broadcast %cst_11 : f32 to vector<8x8xf32>
    %23 = arith.mulf %21, %22 : vector<8x8xf32>
    %cst_12 = arith.constant -1.000000e+30 : f32
    %24 = vector.broadcast %cst_12 : f32 to vector<8x8xf32>
    %25 = arith.select %18, %23, %24 : vector<8x8xi1>, vector<8x8xf32>
    %cst_13 = arith.constant dense<0xFF800000> : vector<8xf32>
    %26 = vector.multi_reduction <maximumf>, %25, %cst_13 [1] : vector<8x8xf32> to vector<8xf32>
    %27 = vector.shape_cast %26 : vector<8xf32> to vector<8x1xf32>
    %28 = vector.broadcast %27 : vector<8x1xf32> to vector<8x8xf32>
    %29 = arith.subf %25, %28 : vector<8x8xf32>
    %30 = math.exp %29 : vector<8x8xf32>
    %cst_14 = arith.constant dense<0.000000e+00> : vector<8xf32>
    %31 = vector.multi_reduction <add>, %30, %cst_14 [1] : vector<8x8xf32> to vector<8xf32>
    %32 = vector.shape_cast %31 : vector<8xf32> to vector<8x1xf32>
    %33 = tpu.reciprocal %32 {approx = true} : vector<8x1xf32> -> vector<8x1xf32>
    %34 = vector.broadcast %33 : vector<8x1xf32> to vector<8x8xf32>
    %35 = arith.mulf %30, %34 : vector<8x8xf32>
    %36 = arith.truncf %35 : vector<8x8xf32> to vector<8x8xbf16>
    %37 = vector.extract_strided_slice %5 {offsets = [0, 0], sizes = [8, 8], strides = [1, 1]} : vector<8x32xbf16> to vector<8x8xbf16>
    %cst_15 = arith.constant dense<0.000000e+00> : vector<8x8xf32>
    %38 = tpu.matmul %36, %37, %cst_15 {dimension_numbers = #tpu.dot_dimension_numbers<[1], [0], [0], [1], [0, 0, 1, 1], [], []>} : vector<8x8xbf16>, vector<8x8xbf16>, vector<8x8xf32> -> vector<8x8xf32>
    %39 = arith.truncf %38 : vector<8x8xf32> to vector<8x8xbf16>
    %c0_16 = arith.constant 0 : index
    %c0_17 = arith.constant 0 : index
    %c0_18 = arith.constant 0 : index
    %40 = vector.load %arg6[%c0_16, %c0_17, %c0_18] : memref<1x8x32xbf16, #tpu.memory_space<vmem>>, vector<1x8x8xbf16>
    %41 = vector.shape_cast %40 : vector<1x8x8xbf16> to vector<8x8xbf16>
    %42 = vector.shape_cast %39 : vector<8x8xbf16> to vector<1x8x8xbf16>
    tpu.vector_store %arg6[%c0_16, %c0_17, %c0_18], %42 {strides = array<i32>} : memref<1x8x32xbf16, #tpu.memory_space<vmem>>, vector<1x8x8xbf16>,
    %43 = vector.extract_strided_slice %1 {offsets = [0, 8], sizes = [8, 8], strides = [1, 1]} : vector<8x32xbf16> to vector<8x8xbf16>
    %44 = vector.extract_strided_slice %3 {offsets = [0, 8], sizes = [8, 8], strides = [1, 1]} : vector<8x32xbf16> to vector<8x8xbf16>
    %cst_19 = arith.constant dense<0.000000e+00> : vector<8x8xf32>
    %45 = tpu.matmul %43, %44, %cst_19 {dimension_numbers = #tpu.dot_dimension_numbers<[1], [1], [0], [0], [0, 0, 1, 0], [], []>} : vector<8x8xbf16>, vector<8x8xbf16>, vector<8x8xf32> -> vector<8x8xf32>
    %cst_20 = arith.constant 0.353553385 : f32
    %46 = vector.broadcast %cst_20 : f32 to vector<8x8xf32>
    %47 = arith.mulf %45, %46 : vector<8x8xf32>
    %cst_21 = arith.constant -1.000000e+30 : f32
    %48 = vector.broadcast %cst_21 : f32 to vector<8x8xf32>
    %49 = arith.select %18, %47, %48 : vector<8x8xi1>, vector<8x8xf32>
    %cst_22 = arith.constant dense<0xFF800000> : vector<8xf32>
    %50 = vector.multi_reduction <maximumf>, %49, %cst_22 [1] : vector<8x8xf32> to vector<8xf32>
    %51 = vector.shape_cast %50 : vector<8xf32> to vector<8x1xf32>
    %52 = vector.broadcast %51 : vector<8x1xf32> to vector<8x8xf32>
    %53 = arith.subf %49, %52 : vector<8x8xf32>
    %54 = math.exp %53 : vector<8x8xf32>
    %cst_23 = arith.constant dense<0.000000e+00> : vector<8xf32>
    %55 = vector.multi_reduction <add>, %54, %cst_23 [1] : vector<8x8xf32> to vector<8xf32>
    %56 = vector.shape_cast %55 : vector<8xf32> to vector<8x1xf32>
    %57 = tpu.reciprocal %56 {approx = true} : vector<8x1xf32> -> vector<8x1xf32>
    %58 = vector.broadcast %57 : vector<8x1xf32> to vector<8x8xf32>
    %59 = arith.mulf %54, %58 : vector<8x8xf32>
    %60 = arith.truncf %59 : vector<8x8xf32> to vector<8x8xbf16>
    %61 = vector.extract_strided_slice %5 {offsets = [0, 8], sizes = [8, 8], strides = [1, 1]} : vector<8x32xbf16> to vector<8x8xbf16>
    %cst_24 = arith.constant dense<0.000000e+00> : vector<8x8xf32>
    %62 = tpu.matmul %60, %61, %cst_24 {dimension_numbers = #tpu.dot_dimension_numbers<[1], [0], [0], [1], [0, 0, 1, 1], [], []>} : vector<8x8xbf16>, vector<8x8xbf16>, vector<8x8xf32> -> vector<8x8xf32>
    %63 = arith.truncf %62 : vector<8x8xf32> to vector<8x8xbf16>
    %c0_25 = arith.constant 0 : index
    %c0_26 = arith.constant 0 : index
    %c8 = arith.constant 8 : index
    %64 = vector.load %arg6[%c0_25, %c0_26, %c8] : memref<1x8x32xbf16, #tpu.memory_space<vmem>>, vector<1x8x8xbf16>
    %65 = vector.shape_cast %64 : vector<1x8x8xbf16> to vector<8x8xbf16>
    %66 = vector.shape_cast %63 : vector<8x8xbf16> to vector<1x8x8xbf16>
    tpu.vector_store %arg6[%c0_25, %c0_26, %c8], %66 {strides = array<i32>} : memref<1x8x32xbf16, #tpu.memory_space<vmem>>, vector<1x8x8xbf16>,
    %67 = vector.extract_strided_slice %1 {offsets = [0, 16], sizes = [8, 8], strides = [1, 1]} : vector<8x32xbf16> to vector<8x8xbf16>
    %68 = vector.extract_strided_slice %3 {offsets = [0, 16], sizes = [8, 8], strides = [1, 1]} : vector<8x32xbf16> to vector<8x8xbf16>
    %cst_27 = arith.constant dense<0.000000e+00> : vector<8x8xf32>
    %69 = tpu.matmul %67, %68, %cst_27 {dimension_numbers = #tpu.dot_dimension_numbers<[1], [1], [0], [0], [0, 0, 1, 0], [], []>} : vector<8x8xbf16>, vector<8x8xbf16>, vector<8x8xf32> -> vector<8x8xf32>
    %cst_28 = arith.constant 0.353553385 : f32
    %70 = vector.broadcast %cst_28 : f32 to vector<8x8xf32>
    %71 = arith.mulf %69, %70 : vector<8x8xf32>
    %cst_29 = arith.constant -1.000000e+30 : f32
    %72 = vector.broadcast %cst_29 : f32 to vector<8x8xf32>
    %73 = arith.select %18, %71, %72 : vector<8x8xi1>, vector<8x8xf32>
    %cst_30 = arith.constant dense<0xFF800000> : vector<8xf32>
    %74 = vector.multi_reduction <maximumf>, %73, %cst_30 [1] : vector<8x8xf32> to vector<8xf32>
    %75 = vector.shape_cast %74 : vector<8xf32> to vector<8x1xf32>
    %76 = vector.broadcast %75 : vector<8x1xf32> to vector<8x8xf32>
    %77 = arith.subf %73, %76 : vector<8x8xf32>
    %78 = math.exp %77 : vector<8x8xf32>
    %cst_31 = arith.constant dense<0.000000e+00> : vector<8xf32>
    %79 = vector.multi_reduction <add>, %78, %cst_31 [1] : vector<8x8xf32> to vector<8xf32>
    %80 = vector.shape_cast %79 : vector<8xf32> to vector<8x1xf32>
    %81 = tpu.reciprocal %80 {approx = true} : vector<8x1xf32> -> vector<8x1xf32>
    %82 = vector.broadcast %81 : vector<8x1xf32> to vector<8x8xf32>
    %83 = arith.mulf %78, %82 : vector<8x8xf32>
    %84 = arith.truncf %83 : vector<8x8xf32> to vector<8x8xbf16>
    %85 = vector.extract_strided_slice %5 {offsets = [0, 16], sizes = [8, 8], strides = [1, 1]} : vector<8x32xbf16> to vector<8x8xbf16>
    %cst_32 = arith.constant dense<0.000000e+00> : vector<8x8xf32>
    %86 = tpu.matmul %84, %85, %cst_32 {dimension_numbers = #tpu.dot_dimension_numbers<[1], [0], [0], [1], [0, 0, 1, 1], [], []>} : vector<8x8xbf16>, vector<8x8xbf16>, vector<8x8xf32> -> vector<8x8xf32>
    %87 = arith.truncf %86 : vector<8x8xf32> to vector<8x8xbf16>
    %c0_33 = arith.constant 0 : index
    %c0_34 = arith.constant 0 : index
    %c16 = arith.constant 16 : index
    %88 = vector.load %arg6[%c0_33, %c0_34, %c16] : memref<1x8x32xbf16, #tpu.memory_space<vmem>>, vector<1x8x8xbf16>
    %89 = vector.shape_cast %88 : vector<1x8x8xbf16> to vector<8x8xbf16>
    %90 = vector.shape_cast %87 : vector<8x8xbf16> to vector<1x8x8xbf16>
    tpu.vector_store %arg6[%c0_33, %c0_34, %c16], %90 {strides = array<i32>} : memref<1x8x32xbf16, #tpu.memory_space<vmem>>, vector<1x8x8xbf16>,
    %91 = vector.extract_strided_slice %1 {offsets = [0, 24], sizes = [8, 8], strides = [1, 1]} : vector<8x32xbf16> to vector<8x8xbf16>
    %92 = vector.extract_strided_slice %3 {offsets = [0, 24], sizes = [8, 8], strides = [1, 1]} : vector<8x32xbf16> to vector<8x8xbf16>
    %cst_35 = arith.constant dense<0.000000e+00> : vector<8x8xf32>
    %93 = tpu.matmul %91, %92, %cst_35 {dimension_numbers = #tpu.dot_dimension_numbers<[1], [1], [0], [0], [0, 0, 1, 0], [], []>} : vector<8x8xbf16>, vector<8x8xbf16>, vector<8x8xf32> -> vector<8x8xf32>
    %cst_36 = arith.constant 0.353553385 : f32
    %94 = vector.broadcast %cst_36 : f32 to vector<8x8xf32>
    %95 = arith.mulf %93, %94 : vector<8x8xf32>
    %cst_37 = arith.constant -1.000000e+30 : f32
    %96 = vector.broadcast %cst_37 : f32 to vector<8x8xf32>
    %97 = arith.select %18, %95, %96 : vector<8x8xi1>, vector<8x8xf32>
    %cst_38 = arith.constant dense<0xFF800000> : vector<8xf32>
    %98 = vector.multi_reduction <maximumf>, %97, %cst_38 [1] : vector<8x8xf32> to vector<8xf32>
    %99 = vector.shape_cast %98 : vector<8xf32> to vector<8x1xf32>
    %100 = vector.broadcast %99 : vector<8x1xf32> to vector<8x8xf32>
    %101 = arith.subf %97, %100 : vector<8x8xf32>
    %102 = math.exp %101 : vector<8x8xf32>
    %cst_39 = arith.constant dense<0.000000e+00> : vector<8xf32>
    %103 = vector.multi_reduction <add>, %102, %cst_39 [1] : vector<8x8xf32> to vector<8xf32>
    %104 = vector.shape_cast %103 : vector<8xf32> to vector<8x1xf32>
    %105 = tpu.reciprocal %104 {approx = true} : vector<8x1xf32> -> vector<8x1xf32>
    %106 = vector.broadcast %105 : vector<8x1xf32> to vector<8x8xf32>
    %107 = arith.mulf %102, %106 : vector<8x8xf32>
    %108 = arith.truncf %107 : vector<8x8xf32> to vector<8x8xbf16>
    %109 = vector.extract_strided_slice %5 {offsets = [0, 24], sizes = [8, 8], strides = [1, 1]} : vector<8x32xbf16> to vector<8x8xbf16>
    %cst_40 = arith.constant dense<0.000000e+00> : vector<8x8xf32>
    %110 = tpu.matmul %108, %109, %cst_40 {dimension_numbers = #tpu.dot_dimension_numbers<[1], [0], [0], [1], [0, 0, 1, 1], [], []>} : vector<8x8xbf16>, vector<8x8xbf16>, vector<8x8xf32> -> vector<8x8xf32>
    %111 = arith.truncf %110 : vector<8x8xf32> to vector<8x8xbf16>
    %c0_41 = arith.constant 0 : index
    %c0_42 = arith.constant 0 : index
    %c24 = arith.constant 24 : index
    %112 = vector.load %arg6[%c0_41, %c0_42, %c24] : memref<1x8x32xbf16, #tpu.memory_space<vmem>>, vector<1x8x8xbf16>
    %113 = vector.shape_cast %112 : vector<1x8x8xbf16> to vector<8x8xbf16>
    %114 = vector.shape_cast %111 : vector<8x8xbf16> to vector<1x8x8xbf16>
    tpu.vector_store %arg6[%c0_41, %c0_42, %c24], %114 {strides = array<i32>} : memref<1x8x32xbf16, #tpu.memory_space<vmem>>, vector<1x8x8xbf16>,
    return
  }
  func.func @transform_0(%arg0: i32, %arg1: i32) -> (i32, i32, i32) {
    %c0_i32 = arith.constant 0 : i32
    %c0_i32_0 = arith.constant 0 : i32
    return %arg0, %arg1, %c0_i32 : i32, i32, i32
  }
  func.func @transform_1(%arg0: i32, %arg1: i32) -> (i32, i32, i32) {
    %c0_i32 = arith.constant 0 : i32
    %c0_i32_0 = arith.constant 0 : i32
    %c0_i32_1 = arith.constant 0 : i32
    return %arg0, %c0_i32, %c0_i32_0 : i32, i32, i32
  }
  func.func @transform_2(%arg0: i32, %arg1: i32) -> (i32, i32, i32) {
    %c0_i32 = arith.constant 0 : i32
    %c0_i32_0 = arith.constant 0 : i32
    %c0_i32_1 = arith.constant 0 : i32
    return %arg0, %c0_i32, %c0_i32_0 : i32, i32, i32
  }
  func.func @transform_3(%arg0: i32, %arg1: i32) -> (i32, i32, i32) {
    %c0_i32 = arith.constant 0 : i32
    %c0_i32_0 = arith.constant 0 : i32
    %c0_i32_1 = arith.constant 0 : i32
    return %arg0, %c0_i32, %c0_i32_0 : i32, i32, i32
  }
  func.func @transform_4(%arg0: i32, %arg1: i32) -> (i32, i32, i32) {
    %c0_i32 = arith.constant 0 : i32
    %c0_i32_0 = arith.constant 0 : i32
    return %arg0, %arg1, %c0_i32 : i32, i32, i32
  }
}

module attributes {stable_mosaic.version = 11 : i64} {
  func.func @_linear_kernel(%arg0: i32, %arg1: i32, %arg2: i32, %arg3: memref<16x32xbf16, #tpu.memory_space<vmem>>, %arg4: memref<32x32xbf16, #tpu.memory_space<vmem>>, %arg5: memref<1x32xf32, #tpu.memory_space<vmem>>, %arg6: memref<16x32xbf16, #tpu.memory_space<vmem>>, %arg7: memref<16x32xf32, #tpu.memory_space<vmem>>) attributes {dimension_semantics = [#tpu.dimension_semantics<parallel>, #tpu.dimension_semantics<parallel>, #tpu.dimension_semantics<arbitrary>], iteration_bounds = array<i64: 1, 1, 1>, scalar_prefetch = 0 : i64, scratch_operands = 1 : i64, tpu.core_type = #tpu.core_type<tc>, window_params = [{transform_indices = @transform_0, window_bounds = array<i64: 16, 32>}, {transform_indices = @transform_1, window_bounds = array<i64: 32, 32>}, {transform_indices = @transform_2, window_bounds = array<i64: 1, 32>}, {transform_indices = @transform_3, window_bounds = array<i64: 16, 32>}]} {
    %c0_i32 = arith.constant 0 : i32
    %0 = arith.cmpi eq, %arg2, %c0_i32 : i32
    %1 = arith.extui %0 : i1 to i32
    %c0_i32_0 = arith.constant 0 : i32
    %2 = arith.cmpi ne, %1, %c0_i32_0 : i32
    scf.if %2 {
      %cst_10 = arith.constant 0.000000e+00 : f32
      %12 = vector.broadcast %cst_10 : f32 to vector<16x32xf32>
      %c0_11 = arith.constant 0 : index
      %c0_12 = arith.constant 0 : index
      %13 = vector.load %arg7[%c0_11, %c0_12] : memref<16x32xf32, #tpu.memory_space<vmem>>, vector<16x32xf32>
      tpu.vector_store %arg7[%c0_11, %c0_12], %12 {strides = array<i32>} : memref<16x32xf32, #tpu.memory_space<vmem>>, vector<16x32xf32>,
    } else {
    }
    %c0 = arith.constant 0 : index
    %c0_1 = arith.constant 0 : index
    %3 = vector.load %arg7[%c0, %c0_1] : memref<16x32xf32, #tpu.memory_space<vmem>>, vector<16x32xf32>
    %c0_2 = arith.constant 0 : index
    %c0_3 = arith.constant 0 : index
    %4 = vector.load %arg3[%c0_2, %c0_3] : memref<16x32xbf16, #tpu.memory_space<vmem>>, vector<16x32xbf16>
    %c0_4 = arith.constant 0 : index
    %c0_5 = arith.constant 0 : index
    %5 = vector.load %arg4[%c0_4, %c0_5] : memref<32x32xbf16, #tpu.memory_space<vmem>>, vector<32x32xbf16>
    %cst = arith.constant dense<0.000000e+00> : vector<16x32xf32>
    %6 = tpu.matmul %4, %5, %cst {dimension_numbers = #tpu.dot_dimension_numbers<[1], [0], [0], [1], [0, 0, 1, 1], [], []>} : vector<16x32xbf16>, vector<32x32xbf16>, vector<16x32xf32> -> vector<16x32xf32>
    %7 = arith.addf %3, %6 : vector<16x32xf32>
    %c0_6 = arith.constant 0 : index
    %c0_7 = arith.constant 0 : index
    %8 = vector.load %arg7[%c0_6, %c0_7] : memref<16x32xf32, #tpu.memory_space<vmem>>, vector<16x32xf32>
    tpu.vector_store %arg7[%c0_6, %c0_7], %7 {strides = array<i32>} : memref<16x32xf32, #tpu.memory_space<vmem>>, vector<16x32xf32>,
    %c0_i32_8 = arith.constant 0 : i32
    %9 = arith.cmpi eq, %arg2, %c0_i32_8 : i32
    %10 = arith.extui %9 : i1 to i32
    %c0_i32_9 = arith.constant 0 : i32
    %11 = arith.cmpi ne, %10, %c0_i32_9 : i32
    scf.if %11 {
      %c0_10 = arith.constant 0 : index
      %c0_11 = arith.constant 0 : index
      %12 = vector.load %arg7[%c0_10, %c0_11] : memref<16x32xf32, #tpu.memory_space<vmem>>, vector<16x32xf32>
      %c0_12 = arith.constant 0 : index
      %c0_13 = arith.constant 0 : index
      %13 = vector.load %arg5[%c0_12, %c0_13] : memref<1x32xf32, #tpu.memory_space<vmem>>, vector<1x32xf32>
      %14 = vector.broadcast %13 : vector<1x32xf32> to vector<16x32xf32>
      %15 = arith.addf %12, %14 : vector<16x32xf32>
      %16 = arith.truncf %15 : vector<16x32xf32> to vector<16x32xbf16>
      %c0_14 = arith.constant 0 : index
      %c0_15 = arith.constant 0 : index
      %17 = vector.load %arg6[%c0_14, %c0_15] : memref<16x32xbf16, #tpu.memory_space<vmem>>, vector<16x32xbf16>
      tpu.vector_store %arg6[%c0_14, %c0_15], %16 {strides = array<i32>} : memref<16x32xbf16, #tpu.memory_space<vmem>>, vector<16x32xbf16>,
    } else {
    }
    return
  }
  func.func @transform_0(%arg0: i32, %arg1: i32, %arg2: i32) -> (i32, i32) {
    %c0_i32 = arith.constant 0 : i32
    return %arg0, %arg2 : i32, i32
  }
  func.func @transform_1(%arg0: i32, %arg1: i32, %arg2: i32) -> (i32, i32) {
    %c0_i32 = arith.constant 0 : i32
    return %arg2, %arg1 : i32, i32
  }
  func.func @transform_2(%arg0: i32, %arg1: i32, %arg2: i32) -> (i32, i32) {
    %c0_i32 = arith.constant 0 : i32
    %c0_i32_0 = arith.constant 0 : i32
    return %c0_i32, %arg1 : i32, i32
  }
  func.func @transform_3(%arg0: i32, %arg1: i32, %arg2: i32) -> (i32, i32) {
    %c0_i32 = arith.constant 0 : i32
    return %arg0, %arg1 : i32, i32
  }
}

module attributes {stable_mosaic.version = 11 : i64} {
  func.func @_linear_kernel(%arg0: i32, %arg1: i32, %arg2: i32, %arg3: memref<16x32xbf16, #tpu.memory_space<vmem>>, %arg4: memref<32x128xbf16, #tpu.memory_space<vmem>>, %arg5: memref<1x128xf32, #tpu.memory_space<vmem>>, %arg6: memref<16x128xf32, #tpu.memory_space<vmem>>, %arg7: memref<16x128xf32, #tpu.memory_space<vmem>>) attributes {dimension_semantics = [#tpu.dimension_semantics<parallel>, #tpu.dimension_semantics<parallel>, #tpu.dimension_semantics<arbitrary>], iteration_bounds = array<i64: 1, 1, 1>, scalar_prefetch = 0 : i64, scratch_operands = 1 : i64, tpu.core_type = #tpu.core_type<tc>, window_params = [{transform_indices = @transform_0, window_bounds = array<i64: 16, 32>}, {transform_indices = @transform_1, window_bounds = array<i64: 32, 128>}, {transform_indices = @transform_2, window_bounds = array<i64: 1, 128>}, {transform_indices = @transform_3, window_bounds = array<i64: 16, 128>}]} {
    %c0_i32 = arith.constant 0 : i32
    %0 = arith.cmpi eq, %arg2, %c0_i32 : i32
    %1 = arith.extui %0 : i1 to i32
    %c0_i32_0 = arith.constant 0 : i32
    %2 = arith.cmpi ne, %1, %c0_i32_0 : i32
    scf.if %2 {
      %cst_10 = arith.constant 0.000000e+00 : f32
      %12 = vector.broadcast %cst_10 : f32 to vector<16x128xf32>
      %c0_11 = arith.constant 0 : index
      %c0_12 = arith.constant 0 : index
      %13 = vector.load %arg7[%c0_11, %c0_12] : memref<16x128xf32, #tpu.memory_space<vmem>>, vector<16x128xf32>
      tpu.vector_store %arg7[%c0_11, %c0_12], %12 {strides = array<i32>} : memref<16x128xf32, #tpu.memory_space<vmem>>, vector<16x128xf32>,
    } else {
    }
    %c0 = arith.constant 0 : index
    %c0_1 = arith.constant 0 : index
    %3 = vector.load %arg7[%c0, %c0_1] : memref<16x128xf32, #tpu.memory_space<vmem>>, vector<16x128xf32>
    %c0_2 = arith.constant 0 : index
    %c0_3 = arith.constant 0 : index
    %4 = vector.load %arg3[%c0_2, %c0_3] : memref<16x32xbf16, #tpu.memory_space<vmem>>, vector<16x32xbf16>
    %c0_4 = arith.constant 0 : index
    %c0_5 = arith.constant 0 : index
    %5 = vector.load %arg4[%c0_4, %c0_5] : memref<32x128xbf16, #tpu.memory_space<vmem>>, vector<32x128xbf16>
    %cst = arith.constant dense<0.000000e+00> : vector<16x128xf32>
    %6 = tpu.matmul %4, %5, %cst {dimension_numbers = #tpu.dot_dimension_numbers<[1], [0], [0], [1], [0, 0, 1, 1], [], []>} : vector<16x32xbf16>, vector<32x128xbf16>, vector<16x128xf32> -> vector<16x128xf32>
    %7 = arith.addf %3, %6 : vector<16x128xf32>
    %c0_6 = arith.constant 0 : index
    %c0_7 = arith.constant 0 : index
    %8 = vector.load %arg7[%c0_6, %c0_7] : memref<16x128xf32, #tpu.memory_space<vmem>>, vector<16x128xf32>
    tpu.vector_store %arg7[%c0_6, %c0_7], %7 {strides = array<i32>} : memref<16x128xf32, #tpu.memory_space<vmem>>, vector<16x128xf32>,
    %c0_i32_8 = arith.constant 0 : i32
    %9 = arith.cmpi eq, %arg2, %c0_i32_8 : i32
    %10 = arith.extui %9 : i1 to i32
    %c0_i32_9 = arith.constant 0 : i32
    %11 = arith.cmpi ne, %10, %c0_i32_9 : i32
    scf.if %11 {
      %c0_10 = arith.constant 0 : index
      %c0_11 = arith.constant 0 : index
      %12 = vector.load %arg7[%c0_10, %c0_11] : memref<16x128xf32, #tpu.memory_space<vmem>>, vector<16x128xf32>
      %c0_12 = arith.constant 0 : index
      %c0_13 = arith.constant 0 : index
      %13 = vector.load %arg5[%c0_12, %c0_13] : memref<1x128xf32, #tpu.memory_space<vmem>>, vector<1x128xf32>
      %14 = vector.broadcast %13 : vector<1x128xf32> to vector<16x128xf32>
      %15 = arith.addf %12, %14 : vector<16x128xf32>
      %c0_14 = arith.constant 0 : index
      %c0_15 = arith.constant 0 : index
      %16 = vector.load %arg6[%c0_14, %c0_15] : memref<16x128xf32, #tpu.memory_space<vmem>>, vector<16x128xf32>
      tpu.vector_store %arg6[%c0_14, %c0_15], %15 {strides = array<i32>} : memref<16x128xf32, #tpu.memory_space<vmem>>, vector<16x128xf32>,
    } else {
    }
    return
  }
  func.func @transform_0(%arg0: i32, %arg1: i32, %arg2: i32) -> (i32, i32) {
    %c0_i32 = arith.constant 0 : i32
    return %arg0, %arg2 : i32, i32
  }
  func.func @transform_1(%arg0: i32, %arg1: i32, %arg2: i32) -> (i32, i32) {
    %c0_i32 = arith.constant 0 : i32
    return %arg2, %arg1 : i32, i32
  }
  func.func @transform_2(%arg0: i32, %arg1: i32, %arg2: i32) -> (i32, i32) {
    %c0_i32 = arith.constant 0 : i32
    %c0_i32_0 = arith.constant 0 : i32
    return %c0_i32, %arg1 : i32, i32
  }
  func.func @transform_3(%arg0: i32, %arg1: i32, %arg2: i32) -> (i32, i32) {
    %c0_i32 = arith.constant 0 : i32
    return %arg0, %arg1 : i32, i32
  }
}

</mosaic_0001>

<bundles_post_ra>
// kernel: transformer_forward.31
= control target key start
LH: loop header
LB: loop body
LE: loop exit
PB: predicated region body
PF: predicated region fallthrough
CT: control target
= control target key end

     0   :  { %vm28_vm0 = vcmask 261120   ;;  %v220_v0 = vmov 0.0   ;;  %vm221_vm1 = vmmov 0   ;;  %vm178_vm2 = vcmask 257024   ;;  %s293_s1 = inlined_call_operand.vmem [shape: bf16[32,32], index: 1, kind: input, shape index: {}]   ;;  %s294_s0 = inlined_call_operand.vmem [shape: bf16[16,32], index: 0, kind: input, shape index: {}]   ;;  %s295_s3 = inlined_call_operand.vmem [shape: bf16[16,32], index: 3, kind: input, shape index: {}]   ;;  %s296_s2 = inlined_call_operand.vmem [shape: f32[1,32], index: 2, kind: input, shape index: {}]   ;;  %s297_s4 = inlined_call_operand.vmem [shape: f32[1,32], index: 4, kind: input, shape index: {}]   ;;  %s298_s5 = inlined_call_operand.vmem [shape: f32[1,32], index: 5, kind: input, shape index: {}]   ;;  %s299_s6 = inlined_call_operand.vmem [shape: bf16[16,32], index: 6, kind: output, shape index: {}]  }
   0x1   :  { %203 = vmatprep.subr.bf16.mxu0 %v220_v0  ;;  %v213_v1 = vld [vmem:[%s293_s1] sm:$0xff]   ;;  %207 = vmatprep.mubr.msk.bf16.mxu0 %vm221_vm1, %v220_v0  ;;  %29 = vst.msk [vmem:[#allocation2] sm:$0xff] %vm28_vm0, %v220_v0  ;;  %30 = vst.msk [vmem:[#allocation2 + $0x8] sm:$0xff] %vm28_vm0, %v220_v0  ;;  %v214_v2 = vld [vmem:[%s293_s1 + $0x8] sm:$0xff]  }
   0x2   :  { %204 = vmatpush3.bf16.msra.mxu0 %v213_v1  ;;  %v215_v3 = vld [vmem:[%s294_s0] sm:$0xff]  }
   0x3   :  { %205 = vmatprep.subr.bf16.mxu0 %v220_v0  ;;  %v197_v12 = vld [vmem:[%s295_s3] sm:$0xff]  }
   0x4   :  { %v189_v13 = vld [vmem:[%s296_s2] ss:$0 sm:$0xff]  ;;  %v198_v14 = vunpack.c.l.bf16 %v197_v12  ;;  %v199_v17 = vunpack.c.h.bf16 %v197_v12 }
   0x5   :  { %v190_v41 = vld [vmem:[%s297_s4] ss:$0 sm:$0xff] }
   0x6   :  { %206 = vmatpush3.bf16.msra.mxu0 %v214_v2  ;;  %v191_v43 = vld [vmem:[%s298_s5] ss:$0 sm:$0xff] }
   0x8   :  { %v31_v4 = vld [vmem:[#allocation2] sm:$0xff]  ;;  %v32_v6 = vld [vmem:[#allocation2 + $0x8] sm:$0xff] }
   0x9   :  { %208 = vmatmul.mubr.msk.bf16.vlgmr.msra.gmra.mrb[0].mxu0 %vm28_vm0, %v215_v3 }
  0xdc   :  { %v94_v5 = vpop.f32.mrb[0].mxu0 }
  0xdd   :  { %v101_v7 = vadd.f32 %v94_v5, %v31_v4  ;;  %v209_v8 = vpop.f32.mrb[1].mxu0 }
  0xde   :  { %v97_v9 = vpop.f32.mrb[2].mxu0 }
  0xdf   :  { %103 = vst.msk [vmem:[#allocation2] sm:$0xff] %vm28_vm0, %v101_v7  ;;  %v102_v10 = vadd.f32 %v97_v9, %v32_v6  ;;  %v210_v11 = vpop.f32.mrb[3].mxu0 }
  0xe1   :  { %104 = vst.msk [vmem:[#allocation2 + $0x8] sm:$0xff] %vm28_vm0, %v102_v10 }
  0xe6   :  { %v108_v15 = vld [vmem:[#allocation2] sm:$0xff] }
  0xe7   :  { %v117_v16 = vadd.f32 %v189_v13, %v108_v15 }
  0xe8   :  { %v109_v18 = vld [vmem:[#allocation2 + $0x8] sm:$0xff] }
  0xe9   :  { %v123_v19 = vadd.f32 %v198_v14, %v117_v16  ;;  %v118_v20 = vadd.f32 %v189_v13, %v109_v18 }
  0xeb   :  { %v125_v21 = vsel %vm28_vm0, %v123_v19, 0.0  ;;  %v124_v22 = vadd.f32 %v199_v17, %v118_v20 }
  0xec   :  { %126 = vadd.xlane.f32.xlu0 %v125_v21 }
  0xed   :  { %v128_v23 = vsel %vm28_vm0, %v124_v22, 0.0 }
  0xf0   :  { %129 = vadd.xlane.f32.xlu0 %v128_v23 }
 0x179   :  { %v127_v24 = vpop.xlane.xlu0 %126 }
 0x17a   :  { %v132_v25 = vmul.f32 0.03125, %v127_v24 }
 0x17c   :  { %v134_v26 = vsub.f32 %v123_v19, %v132_v25 }
 0x17d   :  { %v130_v27 = vpop.xlane.xlu0 %129 }
 0x17e   :  { %v133_v28 = vmul.f32 0.03125, %v130_v27  ;;  %v136_v29 = vmul.f32 %v134_v26, %v134_v26 }
 0x180   :  { %v135_v30 = vsub.f32 %v124_v22, %v133_v28  ;;  %v138_v31 = vsel %vm28_vm0, %v136_v29, 0.0 }
 0x181   :  { %139 = vadd.xlane.f32.xlu1 %v138_v31 }
 0x182   :  { %v137_v32 = vmul.f32 %v135_v30, %v135_v30 }
 0x184   :  { %v141_v33 = vsel %vm28_vm0, %v137_v32, 0.0 }
 0x185   :  { %142 = vadd.xlane.f32.xlu1 %v141_v33 }
 0x20e   :  { %v140_v34 = vpop.xlane.xlu1 %139 }
 0x20f   :  { %v144_v35 = vmul.f32 0.03125, %v140_v34 }
 0x211   :  { %v146_v36 = vadd.f32 1e-05, %v144_v35 }
 0x212   :  { %v143_v37 = vpop.xlane.xlu1 %142 }
 0x213   :  { %216 = vrsqrt.f32 %v146_v36  ;;  %v145_v38 = vmul.f32 0.03125, %v143_v37 }
 0x215   :  { %v147_v39 = vadd.f32 1e-05, %v145_v38 }
 0x217   :  { %218 = vrsqrt.f32 %v147_v39 }
 0x21d   :  { %v217_v40 = vpop.eup %216 }
 0x21e   :  { %v150_v42 = vmul.f32 %v217_v40, %v134_v26 }
 0x220   :  { %v159_v44 = vmul.f32 %v190_v41, %v150_v42 }
 0x221   :  { %v219_v45 = vpop.eup %218 }
 0x222   :  { %v168_v46 = vadd.f32 %v191_v43, %v159_v44  ;;  %v151_v47 = vmul.f32 %v219_v45, %v135_v30 }
 0x224   :  { %v194_v48 = vpack.c.bf16 %v168_v46, %v168_v46  ;;  %v160_v49 = vmul.f32 %v190_v41, %v151_v47 }
 0x226   :  { %179 = vst.msk [vmem:[%s299_s6] sm:$0xf] %vm178_vm2, %v194_v48  ;;  %v169_v50 = vadd.f32 %v191_v43, %v160_v49 }
 0x228   :  { %v195_v51 = vpack.c.bf16 %v169_v50, %v169_v50 }
 0x22a   :  { %180 = vst.msk [vmem:[%s299_s6 + $0x4] sm:$0xf] %vm178_vm2, %v195_v51 }

// kernel: transformer_forward.29
= control target key start
LH: loop header
LB: loop body
LE: loop exit
PB: predicated region body
PF: predicated region fallthrough
CT: control target
= control target key end

     0   :  { %vm19_vm0 = vcmask 785408   ;;  %v151_v0 = vmov 0.0   ;;  %vm152_vm1 = vmmov 0   ;;  %vm47_vm2 = vcmask 261120   ;;  %s195_s1 = inlined_call_operand.vmem [shape: bf16[32,96], index: 1, kind: input, shape index: {}]   ;;  %s196_s0 = inlined_call_operand.vmem [shape: bf16[16,32], index: 0, kind: input, shape index: {}]   ;;  %s197_s2 = inlined_call_operand.vmem [shape: f32[1,96], index: 2, kind: input, shape index: {}]   ;;  %s198_s3 = inlined_call_operand.vmem [shape: bf16[16,96], index: 3, kind: output, shape index: {}]  }
   0x1   :  { %138 = vmatprep.subr.bf16.mxu0 %v151_v0  ;;  %v148_v1 = vld [vmem:[%s195_s1] sm:$0xff]   ;;  %142 = vmatprep.mubr.msk.bf16.mxu0 %vm152_vm1, %v151_v0  ;;  %20 = vst.msk [vmem:[#allocation2] sm:$0xff] %vm19_vm0, %v151_v0  ;;  %21 = vst.msk [vmem:[#allocation2 + $0x8] sm:$0xff] %vm19_vm0, %v151_v0  ;;  %v149_v2 = vld [vmem:[%s195_s1 + $0x8] sm:$0xff]   ;;  %vm119_vm3 = vcmask 781312  }
   0x2   :  { %139 = vmatpush3.bf16.msra.mxu0 %v148_v1  ;;  %v150_v3 = vld [vmem:[%s196_s0] sm:$0xff]  }
   0x3   :  { %140 = vmatprep.subr.bf16.mxu0 %v151_v0  ;;  %v130_v12 = vld [vmem:[%s197_s2] ss:$0 sm:$0xff] }
   0x6   :  { %141 = vmatpush3.bf16.msra.mxu0 %v149_v2 }
   0x8   :  { %v22_v4 = vld [vmem:[#allocation2] sm:$0xff]  ;;  %v23_v6 = vld [vmem:[#allocation2 + $0x8] sm:$0xff] }
   0x9   :  { %143 = vmatmul.mubr.msk.bf16.vlgmr.msra.gmra.mrb[0].mxu0 %vm47_vm2, %v150_v3 }
  0xdc   :  { %v85_v5 = vpop.f32.mrb[0].mxu0 }
  0xdd   :  { %v92_v7 = vadd.f32 %v85_v5, %v22_v4  ;;  %v144_v8 = vpop.f32.mrb[1].mxu0 }
  0xde   :  { %v88_v9 = vpop.f32.mrb[2].mxu0 }
  0xdf   :  { %95 = vst.msk [vmem:[#allocation2] sm:$0xff] %vm19_vm0, %v92_v7  ;;  %v93_v10 = vadd.f32 %v88_v9, %v23_v6  ;;  %v145_v11 = vpop.f32.mrb[3].mxu0 }
  0xe1   :  { %96 = vst.msk [vmem:[#allocation2 + $0x8] sm:$0xff] %vm19_vm0, %v93_v10 }
  0xe6   :  { %v100_v13 = vld [vmem:[#allocation2] sm:$0xff] }
  0xe7   :  { %v109_v14 = vadd.f32 %v130_v12, %v100_v13 }
  0xe8   :  { %v101_v15 = vld [vmem:[#allocation2 + $0x8] sm:$0xff] }
  0xe9   :  { %v133_v16 = vpack.c.bf16 %v109_v14, %v109_v14  ;;  %v110_v17 = vadd.f32 %v130_v12, %v101_v15 }
  0xeb   :  { %120 = vst.msk [vmem:[%s198_s3] sm:$0xf] %vm119_vm3, %v133_v16  ;;  %v134_v18 = vpack.c.bf16 %v110_v17, %v110_v17 }
  0xed   :  { %121 = vst.msk [vmem:[%s198_s3 + $0x4] sm:$0xf] %vm119_vm3, %v134_v18 }

// kernel: transformer_forward.32
= control target key start
LH: loop header
LB: loop body
LE: loop exit
PB: predicated region body
PF: predicated region fallthrough
CT: control target
= control target key end

     0   :  { %vm19_vm0 = vcmask 523264   ;;  %v153_v0 = vmov 0.0   ;;  %vm154_vm1 = vmmov 0   ;;  %vm47_vm2 = vcmask 261120   ;;  %s197_s1 = inlined_call_operand.vmem [shape: bf16[32,64], index: 1, kind: input, shape index: {}]   ;;  %s198_s0 = inlined_call_operand.vmem [shape: bf16[16,32], index: 0, kind: input, shape index: {}]   ;;  %s199_s2 = inlined_call_operand.vmem [shape: f32[1,64], index: 2, kind: input, shape index: {}]   ;;  %s200_s3 = inlined_call_operand.vmem [shape: bf16[16,64], index: 3, kind: output, shape index: {}]  }
   0x1   :  { %140 = vmatprep.subr.bf16.mxu0 %v153_v0  ;;  %v150_v1 = vld [vmem:[%s197_s1] sm:$0xff]   ;;  %144 = vmatprep.mubr.msk.bf16.mxu0 %vm154_vm1, %v153_v0  ;;  %20 = vst.msk [vmem:[#allocation2] sm:$0xff] %vm19_vm0, %v153_v0  ;;  %21 = vst.msk [vmem:[#allocation2 + $0x8] sm:$0xff] %vm19_vm0, %v153_v0  ;;  %v151_v2 = vld [vmem:[%s197_s1 + $0x8] sm:$0xff]   ;;  %vm121_vm3 = vcmask 519168  }
   0x2   :  { %141 = vmatpush3.bf16.msra.mxu0 %v150_v1  ;;  %v152_v3 = vld [vmem:[%s198_s0] sm:$0xff]  }
   0x3   :  { %142 = vmatprep.subr.bf16.mxu0 %v153_v0  ;;  %v132_v12 = vld [vmem:[%s199_s2] ss:$0 sm:$0xff] }
   0x6   :  { %143 = vmatpush3.bf16.msra.mxu0 %v151_v2 }
   0x8   :  { %v22_v4 = vld [vmem:[#allocation2] sm:$0xff]  ;;  %v23_v6 = vld [vmem:[#allocation2 + $0x8] sm:$0xff] }
   0x9   :  { %145 = vmatmul.mubr.msk.bf16.vlgmr.msra.gmra.mrb[0].mxu0 %vm47_vm2, %v152_v3 }
  0xdc   :  { %v85_v5 = vpop.f32.mrb[0].mxu0 }
  0xdd   :  { %v92_v7 = vadd.f32 %v85_v5, %v22_v4  ;;  %v146_v8 = vpop.f32.mrb[1].mxu0 }
  0xde   :  { %v88_v9 = vpop.f32.mrb[2].mxu0 }
  0xdf   :  { %95 = vst.msk [vmem:[#allocation2] sm:$0xff] %vm19_vm0, %v92_v7  ;;  %v93_v10 = vadd.f32 %v88_v9, %v23_v6  ;;  %v147_v11 = vpop.f32.mrb[3].mxu0 }
  0xe1   :  { %96 = vst.msk [vmem:[#allocation2 + $0x8] sm:$0xff] %vm19_vm0, %v93_v10 }
  0xe6   :  { %v100_v13 = vld [vmem:[#allocation2] sm:$0xff] }
  0xe7   :  { %v109_v14 = vadd.f32 %v132_v12, %v100_v13 }
  0xe8   :  { %v101_v15 = vld [vmem:[#allocation2 + $0x8] sm:$0xff] }
  0xe9   :  { %v111_v16 = vmax.f32 %v109_v14, 0.0  ;;  %v110_v17 = vadd.f32 %v132_v12, %v101_v15 }
  0xeb   :  { %v135_v18 = vpack.c.bf16 %v111_v16, %v111_v16  ;;  %v112_v19 = vmax.f32 %v110_v17, 0.0 }
  0xed   :  { %122 = vst.msk [vmem:[%s200_s3] sm:$0xf] %vm121_vm3, %v135_v18  ;;  %v136_v20 = vpack.c.bf16 %v112_v19, %v112_v19 }
  0xef   :  { %123 = vst.msk [vmem:[%s200_s3 + $0x4] sm:$0xf] %vm121_vm3, %v136_v20 }

// kernel: transformer_forward.30
= control target key start
LH: loop header
LB: loop body
LE: loop exit
PB: predicated region body
PF: predicated region fallthrough
CT: control target
= control target key end

     0   :  { %s1076_s15 = smov 0   ;;  %s1078_s16 = smov 0   ;;  %s1203_s0 = inlined_call_operand.vmem [shape: bf16[2,8,32], index: 0, kind: input, shape index: {}]   ;;  %s1204_s1 = inlined_call_operand.vmem [shape: bf16[2,8,32], index: 1, kind: input, shape index: {}]   ;;  %s1205_s2 = inlined_call_operand.vmem [shape: bf16[2,8,32], index: 2, kind: input, shape index: {}]   ;;  %s1206_s3 = inlined_call_operand.vmem [shape: s32[2,1,8], index: 3, kind: input, shape index: {}]   ;;  %s1207_s4 = inlined_call_operand.vmem [shape: bf16[2,8,32], index: 4, kind: output, shape index: {}]  }
   0x1   :  { %s1080_s17 = smov 0  }
   0x2 LB: > { %s26_s18 = sadd.s32 1, %s1036_s16  ;;  %p878_p0 = scmp.ge.s32.totalorder %s1040_s17, 1  ;;  %s1040_s17 = sphi %s1080_s17, %s14_s17   ;;  %s1036_s16 = sphi %s1078_s16, %s1209_s16   ;;  %s1032_s15 = sphi %s1076_s15, %s1208_s15  }
   0x3   : > { %p28_p1 = scmp.ge.s32.totalorder %s26_s18, 2  ;;  %p206_p2 = scmp.lt.s32.totalorder %s1040_s17, 3 }
   0x5   : > { %s1211_s18 = smov (%p28_p1, %s26_s18), 0  ;;  %p207_p3 = pnand %p878_p0, %p206_p2 }
   0x6   : > { %p247_p4 = scmp.lt.s32.totalorder (!%p207_p3), %s1032_s15, 1  ;;  %v1042_v0 = vmov (!%p207_p3), 0.0   ;;  %vm1043_vm0 = vmmov (!%p207_p3), 0   ;;  %vm284_vm1 = vcmask (!%p207_p3), 64512   ;;  %v279_v4 = vlaneseq (!%p207_p3)  ;;  %s1045_s29 = smov (!%p207_p3), 120  }
   0x7   : > { %210 = sbr.rel (%p207_p3) target bundleno = 1479 (0x5c7), region = 36  ;;  %918 = vmatprep.subr.bf16.mxu0 (!%p207_p3), %v1042_v0  ;;  %920 = vmatprep.mubr.msk.bf16.mxu0 (!%p207_p3), %vm1043_vm0, %v1042_v0  ;;  %v1044_v8 = vmov (!%p207_p3), 0   ;;  %s1046_s30 = smov (!%p207_p3), 112   ;;  %vm348_vm4 = vcmask (!%p207_p3), 1043456   ;;  %vm393_vm5 = vcmask (!%p207_p3), 60416   ;;  %vm523_vm6 = vcmask (!%p207_p3), 126016  }
   0x8   : > { %924 = vmatprep.subr.bf16.mxu1 (!%p207_p3), %v1042_v0  ;;  %926 = vmatprep.mubr.msk.bf16.mxu1 (!%p207_p3), %vm1043_vm0, %v1042_v0  ;;  %v280_v6 = vshrl.u32 (!%p207_p3), %v279_v4, 7  ;;  %s1047_s5 = smov (!%p207_p3), 104   ;;  %s1048_s12 = smov (!%p207_p3), 8   ;;  %vm644_vm7 = vcmask (!%p207_p3), 191616   ;;  %vm765_vm8 = vcmask (!%p207_p3), 257216  }
   0x9   : > { %s1049_s13 = smov (!%p207_p3), 16   ;;  %s1050_s14 = smov (!%p207_p3), 24  }
   0xa   : > { %v281_v7 = vsub.s32 (!%p207_p3), 0, %v280_v6 }
   0xe   : > { %s1213_s15 = smov (!%p247_p4, %s1032_s15), 1 }
   0xf   : > { %s1100_s19 = sshll.u32 %s1213_s15, 2  ;;  %s264_s28 = scalar_lea.vmem %s1206_s3, %s1213_s15 }
  0x10   : > { %s257_s22 = scalar_lea.vmem %s1204_s1, %s1100_s19  ;;  %s253_s25 = scalar_lea.vmem %s1203_s0, %s1100_s19  ;;  %v276_v5 = vld [vmem:[%s264_s28] sm:$0x1] }
  0x11   : > { %v274_v1 = vld [vmem:[%s257_s22] sm:$0xf]  ;;  %vm277_vm2 = vcmp.ne.s32.totalorder %v276_v5, 0  ;;  %s261_s8 = scalar_lea.vmem %s1205_s2, %s1100_s19  ;;  %s1159_s11 = scalar_lea.vmem %s1207_s4, %s1100_s19 }
  0x12   : > { %v289_v2 = vsel %vm284_vm1, %v274_v1, 0  ;;  %v273_v3 = vld [vmem:[%s253_s25] sm:$0xf]  ;;  %v278_v9 = vsel %vm277_vm2, 1, %v1044_v8  ;;  %v886_v18 = vcombine.low %v274_v1, %v274_v1 }
  0x13   : > { %919 = vmatpush3.bf16.xpose.msra.mxu0 %v289_v2  ;;  %v1118_v10 = vrot.slane %v278_v9, %v281_v7  ;;  %v885_v19 = vcombine.low %v273_v3, %v273_v3  ;;  %v1134_v25 = vld [vmem:[%s261_s8] sm:$0xf] }
  0x14   : > { %936 = vmatprep.subr.bf16.mxu0 %v1042_v0  ;;  %403 = vrot.lane.b32.xlu1 %v886_v18, %s1045_s29  ;;  %v350_v26 = vsel %vm348_vm4, %v1134_v25, 0 }
  0x15   : > { %vm283_vm3 = vcmp.eq.s32.totalorder %v1118_v10, 1  ;;  %925 = vmatpush3.bf16.msra.mxu1 %v350_v26 }
  0x16   : > { %930 = vmatprep.subr.bf16.mxu1 %v1042_v0 }
  0x18   : > { %398 = vrot.lane.b32.xlu1 %v885_v19, %s1045_s29 }
  0x1a   : > { %921 = vmatmul.mubr.msk.bf16.vlgmr.msra.gmra.mrb[0].mxu0 %vm284_vm1, %v273_v3 }
  0x1b   : > { %938 = vmatprep.mubr.msk.bf16.mxu0 %vm1043_vm0, %v1042_v0 }
  0x1c   : > { %525 = vrot.lane.b32.xlu1 %v885_v19, %s1046_s30 }
  0x20   : > { %648 = vrot.lane.b32.xlu1 %v886_v18, %s1047_s5 }
  0x24   : > { %646 = vrot.lane.b32.xlu1 %v885_v19, %s1047_s5 }
  0x86   : > { %v404_v29 = vpop.permute.xlu1 %403 }
  0x87   : > { %v409_v31 = vsel %vm284_vm1, %v404_v29, 0 }
  0x8a   : > { %v399_v33 = vpop.permute.xlu1 %398 }
  0x8e   : > { %v526_v35 = vpop.permute.xlu1 %525 }
  0x92   : > { %v649_v37 = vpop.permute.xlu1 %648 }
  0x93   : > { %v654_v38 = vsel %vm284_vm1, %v649_v37, 0 }
  0x96   : > { %v647_v39 = vpop.permute.xlu1 %646 }
  0xed   : > { %v325_v11 = vpop.f32.mrb[0].mxu0 }
  0xee   : > { %v331_v12 = vmul.f32 0.35355338, %v325_v11  ;;  %v922_v13 = vpop.f32.mrb[1].mxu0 }
  0xef   : > { %v328_v14 = vpop.f32.mrb[2].mxu0  ;;  %v888_v13 = vcombine.low %v1134_v25, %v1134_v25 }
  0xf0   : > { %v923_v15 = vpop.f32.mrb[3].mxu0  ;;  %v332_v16 = vsel %vm283_vm3, %v331_v12, -1e+30 }
  0xf1   : > { %v333_v17 = vsel %vm284_vm1, %v332_v16, -inf }
  0xf2   : > { %334 = vmax.xlane.f32.xlu0 %v333_v17 }
 0x17f   : > { %v335_v20 = vpop.xlane.xlu0 %334 }
 0x180   : > { %v336_v21 = vsub.f32 %v332_v16, %v335_v20 }
 0x182   : > { %v337_v22 = vmul.f32 1.442695, %v336_v21 }
 0x184   : > { %1002 = vpow2.f32 %v337_v22 }
 0x18e   : > { %v1003_v23 = vpop.eup %1002 }
 0x18f   : > { %v339_v24 = vsel %vm284_vm1, %v1003_v23, 0.0 }
 0x190   : > { %340 = vadd.xlane.f32.xlu0 %v339_v24 }
 0x1a6   : > { %527 = vrot.lane.b32.xlu0 %v886_v18, %s1046_s30 }
 0x21d   : > { %v341_v27 = vpop.xlane.xlu0 %340 }
 0x21e   : > { %1004 = vrcp.f32 %v341_v27 }
 0x221   : > { %v528_v34 = vpop.permute.xlu0 %527 }
 0x222   : > { %v533_v36 = vsel %vm284_vm1, %v528_v34, 0 }
 0x228   : > { %v1005_v28 = vpop.eup %1004 }
 0x229   : > { %v343_v30 = vmul.f32 %v1005_v28, %v1003_v23 }
 0x22b   : > { %v344_v32 = vpack.c.bf16 %v343_v30, %v343_v30 }
 0x22d   : > { %927 = vmatmul.mubr.msk.bf16.vlgmr.msra.gmra.mrb[0].mxu1 %vm284_vm1, %v344_v32 }
 0x22e   : > { %931 = vmatpush3.bf16.xpose.msra.mxu1 %v409_v31  ;;  %932 = vmatprep.mubr.msk.bf16.mxu1 %vm1043_vm0, %v1042_v0 }
 0x22f   : > { %942 = vmatprep.subr.bf16.mxu1 %v1042_v0 }
 0x235   : > { %933 = vmatmul.mubr.msk.bf16.vlgmr.msra.gmra.mrb[4].mxu1 %vm284_vm1, %v399_v33 }
 0x236   : > { %943 = vmatpush3.bf16.xpose.msra.mxu1 %v533_v36  ;;  %944 = vmatprep.mubr.msk.bf16.mxu1 %vm1043_vm0, %v1042_v0 }
 0x237   : > { %954 = vmatprep.subr.bf16.mxu1 %v1042_v0 }
 0x23d   : > { %945 = vmatmul.mubr.msk.bf16.vlgmr.msra.gmra.mrb[8].mxu1 %vm284_vm1, %v526_v35 }
 0x23e   : > { %955 = vmatpush3.bf16.xpose.msra.mxu1 %v654_v38  ;;  %956 = vmatprep.mubr.msk.bf16.mxu1 %vm1043_vm0, %v1042_v0 }
 0x245   : > { %957 = vmatmul.mubr.msk.bf16.vlgmr.msra.gmra.mrb[12].mxu1 %vm284_vm1, %v647_v39 }
 0x300   : > { %v386_v40 = vpop.f32.mrb[0].mxu1 }
 0x301   : > { %v392_v41 = vpack.c.bf16 %v386_v40, %v386_v40  ;;  %v928_v42 = vpop.f32.mrb[1].mxu1 }
 0x302   : > { %v389_v43 = vpop.f32.mrb[2].mxu1 }
 0x303   : > { %394 = vst.msk [vmem:[%s1159_s11] sm:$0xf] %vm393_vm5, %v392_v41  ;;  %v929_v44 = vpop.f32.mrb[3].mxu1 }
 0x308   : > { %v445_v45 = vpop.f32.mrb[4].mxu1 }
 0x309   : > { %v451_v46 = vmul.f32 0.35355338, %v445_v45  ;;  %v934_v47 = vpop.f32.mrb[5].mxu1 }
 0x30a   : > { %v448_v48 = vpop.f32.mrb[6].mxu1 }
 0x30b   : > { %v935_v49 = vpop.f32.mrb[7].mxu1  ;;  %v452_v50 = vsel %vm283_vm3, %v451_v46, -1e+30 }
 0x30c   : > { %v453_v51 = vsel %vm284_vm1, %v452_v50, -inf }
 0x30d   : > { %454 = vmax.xlane.f32.xlu1 %v453_v51 }
 0x310   : > { %v569_v52 = vpop.f32.mrb[8].mxu1 }
 0x311   : > { %v575_v53 = vmul.f32 0.35355338, %v569_v52  ;;  %v946_v54 = vpop.f32.mrb[9].mxu1 }
 0x312   : > { %v572_v55 = vpop.f32.mrb[10].mxu1 }
 0x313   : > { %v576_v56 = vsel %vm283_vm3, %v575_v53, -1e+30  ;;  %v947_v57 = vpop.f32.mrb[11].mxu1 }
 0x314   : > { %v577_v58 = vsel %vm284_vm1, %v576_v56, -inf }
 0x315   : > { %578 = vmax.xlane.f32.xlu0 %v577_v58 }
 0x318   : > { %v690_v59 = vpop.f32.mrb[12].mxu1 }
 0x319   : > { %v696_v60 = vmul.f32 0.35355338, %v690_v59  ;;  %v958_v61 = vpop.f32.mrb[13].mxu1 }
 0x31a   : > { %v693_v62 = vpop.f32.mrb[14].mxu1 }
 0x31b   : > { %v697_v63 = vsel %vm283_vm3, %v696_v60, -1e+30  ;;  %v959_v1 = vpop.f32.mrb[15].mxu1 }
 0x31c   : > { %v698_v2 = vsel %vm284_vm1, %v697_v63, -inf }
 0x31d   : > { %699 = vmax.xlane.f32.xlu1 %v698_v2 }
 0x39a   : > { %v455_v3 = vpop.xlane.xlu1 %454 }
 0x39b   : > { %v456_v4 = vsub.f32 %v452_v50, %v455_v3 }
 0x39d   : > { %v457_v5 = vmul.f32 1.442695, %v456_v4 }
 0x39f   : > { %1006 = vpow2.f32 %v457_v5 }
 0x3a2   : > { %v579_v6 = vpop.xlane.xlu0 %578 }
 0x3a3   : > { %v580_v7 = vsub.f32 %v576_v56, %v579_v6 }
 0x3a5   : > { %v581_v8 = vmul.f32 1.442695, %v580_v7 }
 0x3a7   : > { %1008 = vpow2.f32 %v581_v8 }
 0x3a9   : > { %v1007_v9 = vpop.eup %1006 }
 0x3aa   : > { %v459_v11 = vsel %vm284_vm1, %v1007_v9, 0.0  ;;  %v700_v14 = vpop.xlane.xlu1 %699 }
 0x3ab   : > { %460 = vadd.xlane.f32.xlu1 %v459_v11  ;;  %v701_v15 = vsub.f32 %v697_v63, %v700_v14 }
 0x3ad   : > { %v702_v16 = vmul.f32 1.442695, %v701_v15 }
 0x3af   : > { %1010 = vpow2.f32 %v702_v16 }
 0x3b1   : > { %v1009_v12 = vpop.eup %1008 }
 0x3b2   : > { %v583_v10 = vsel %vm284_vm1, %v1009_v12, 0.0 }
 0x3b3   : > { %584 = vadd.xlane.f32.xlu0 %v583_v10 }
 0x3b9   : > { %v1011_v17 = vpop.eup %1010 }
 0x3ba   : > { %v704_v18 = vsel %vm284_vm1, %v1011_v17, 0.0 }
 0x3bc   : > { %589 = vrot.lane.b32.xlu1 %v888_v13, %s1046_s30 }
 0x3c9   : > { %468 = vrot.lane.b32.xlu0 %v888_v13, %s1045_s29 }
 0x3e0   : > { %705 = vadd.xlane.f32.xlu1 %v704_v18 }
 0x3f1   : > { %710 = vrot.lane.b32.xlu1 %v888_v13, %s1047_s5 }
 0x438   : > { %v461_v19 = vpop.xlane.xlu1 %460 }
 0x439   : > { %1012 = vrcp.f32 %v461_v19 }
 0x43c   : > { %v590_v25 = vpop.permute.xlu1 %589 }
 0x43d   : > { %v595_v27 = vsel %vm348_vm4, %v590_v25, 0 }
 0x440   : > { %v585_v20 = vpop.xlane.xlu0 %584 }
 0x441   : > { %1014 = vrcp.f32 %v585_v20 }
 0x443   : > { %v1013_v21 = vpop.eup %1012 }
 0x444   : > { %v463_v22 = vmul.f32 %v1013_v21, %v1007_v9  ;;  %v469_v23 = vpop.permute.xlu0 %468 }
 0x445   : > { %v474_v24 = vsel %vm348_vm4, %v469_v23, 0 }
 0x446   : > { %937 = vmatpush3.bf16.msra.mxu0 %v474_v24  ;;  %v464_v26 = vpack.c.bf16 %v463_v22, %v463_v22 }
 0x447   : > { %948 = vmatprep.subr.bf16.mxu0 %v1042_v0 }
 0x449   : > { %939 = vmatmul.mubr.msk.bf16.vlgmr.msra.gmra.mrb[4].mxu0 %vm284_vm1, %v464_v26 }
 0x44a   : > { %949 = vmatpush3.bf16.msra.mxu0 %v595_v27  ;;  %950 = vmatprep.mubr.msk.bf16.mxu0 %vm1043_vm0, %v1042_v0 }
 0x44b   : > { %v1015_v28 = vpop.eup %1014  ;;  %960 = vmatprep.subr.bf16.mxu0 %v1042_v0 }
 0x44c   : > { %v587_v29 = vmul.f32 %v1015_v28, %v1009_v12 }
 0x44e   : > { %v588_v30 = vpack.c.bf16 %v587_v29, %v587_v29 }
 0x451   : > { %951 = vmatmul.mubr.msk.bf16.vlgmr.msra.gmra.mrb[8].mxu0 %vm284_vm1, %v588_v30 }
 0x452   : > { %962 = vmatprep.mubr.msk.bf16.mxu0 %vm1043_vm0, %v1042_v0 }
 0x46d   : > { %v706_v31 = vpop.xlane.xlu1 %705 }
 0x46e   : > { %1016 = vrcp.f32 %v706_v31 }
 0x471   : > { %v711_v32 = vpop.permute.xlu1 %710 }
 0x472   : > { %v716_v33 = vsel %vm348_vm4, %v711_v32, 0 }
 0x473   : > { %961 = vmatpush3.bf16.msra.mxu0 %v716_v33 }
 0x478   : > { %v1017_v34 = vpop.eup %1016 }
 0x479   : > { %v708_v35 = vmul.f32 %v1017_v34, %v1011_v17 }
 0x47b   : > { %v709_v36 = vpack.c.bf16 %v708_v35, %v708_v35 }
 0x47d   : > { %963 = vmatmul.mubr.msk.bf16.vlgmr.msra.gmra.mrb[12].mxu0 %vm284_vm1, %v709_v36 }
 0x51c   : > { %v510_v37 = vpop.f32.mrb[4].mxu0 }
 0x51d   : > { %v899_v38 = vpack.c.bf16 %v510_v37, %v510_v37  ;;  %v940_v39 = vpop.f32.mrb[5].mxu0 }
 0x51e   : > { %v513_v40 = vpop.f32.mrb[6].mxu0 }
 0x51f   : > { %520 = vrot.lane.b32.xlu0 %v899_v38, %s1048_s12  ;;  %v941_v41 = vpop.f32.mrb[7].mxu0 }
 0x524   : > { %v631_v42 = vpop.f32.mrb[8].mxu0 }
 0x525   : > { %v900_v0 = vpack.c.bf16 %v631_v42, %v631_v42  ;;  %v952_v43 = vpop.f32.mrb[9].mxu0 }
 0x526   : > { %v634_v44 = vpop.f32.mrb[10].mxu0 }
 0x527   : > { %641 = vrot.lane.b32.xlu1 %v900_v0, %s1049_s13  ;;  %v953_v45 = vpop.f32.mrb[11].mxu0 }
 0x550   : > { %v752_v46 = vpop.f32.mrb[12].mxu0 }
 0x551   : > { %v901_v47 = vpack.c.bf16 %v752_v46, %v752_v46  ;;  %v964_v48 = vpop.f32.mrb[13].mxu0 }
 0x552   : > { %v755_v49 = vpop.f32.mrb[14].mxu0 }
 0x553   : > { %762 = vrot.lane.b32.xlu0 %v901_v47, %s1050_s14  ;;  %v965_v50 = vpop.f32.mrb[15].mxu0 }
 0x591   : > { %v521_v51 = vpop.permute.xlu0 %520 }
 0x592   : > { %524 = vst.msk [vmem:[%s1159_s11] sm:$0xf] %vm523_vm6, %v521_v51 }
 0x599   : > { %v642_v52 = vpop.permute.xlu1 %641 }
 0x59a   : > { %645 = vst.msk [vmem:[%s1159_s11] sm:$0xf] %vm644_vm7, %v642_v52 }
 0x5c5   : > { %v763_v53 = vpop.permute.xlu0 %762 }
 0x5c6   : > { %766 = vst.msk [vmem:[%s1159_s11] sm:$0xf] %vm765_vm8, %v763_v53 }
 0x5c7 PF: > { %s14_s17 = sadd.s32 1, %s1040_s17   ;;  %s1208_s15 = smov %s1036_s16 }
 0x5c8   : > { %p11_p5 = scmp.ge.s32.totalorder %s14_s17, 4   ;;  %s1209_s16 = smov %s1211_s18 }
 0x5ca   :  { %13 = sbr.rel (!%p11_p5) target bundleno = 2 (0x2), region = 75 }

// kernel: transformer_forward.43
= control target key start
LH: loop header
LB: loop body
LE: loop exit
PB: predicated region body
PF: predicated region fallthrough
CT: control target
= control target key end

     0   :  { %vm19_vm0 = vcmask 523264   ;;  %v151_v0 = vmov 0.0   ;;  %vm152_vm1 = vmmov 0   ;;  %vm47_vm2 = vcmask 261120   ;;  %s195_s1 = inlined_call_operand.vmem [shape: bf16[32,64], index: 1, kind: input, shape index: {}]   ;;  %s196_s0 = inlined_call_operand.vmem [shape: bf16[16,32], index: 0, kind: input, shape index: {}]   ;;  %s197_s2 = inlined_call_operand.vmem [shape: f32[1,64], index: 2, kind: input, shape index: {}]   ;;  %s198_s3 = inlined_call_operand.vmem [shape: bf16[16,64], index: 3, kind: output, shape index: {}]  }
   0x1   :  { %138 = vmatprep.subr.bf16.mxu0 %v151_v0  ;;  %v148_v1 = vld [vmem:[%s195_s1] sm:$0xff]   ;;  %142 = vmatprep.mubr.msk.bf16.mxu0 %vm152_vm1, %v151_v0  ;;  %20 = vst.msk [vmem:[#allocation2] sm:$0xff] %vm19_vm0, %v151_v0  ;;  %21 = vst.msk [vmem:[#allocation2 + $0x8] sm:$0xff] %vm19_vm0, %v151_v0  ;;  %v149_v2 = vld [vmem:[%s195_s1 + $0x8] sm:$0xff]   ;;  %vm119_vm3 = vcmask 519168  }
   0x2   :  { %139 = vmatpush3.bf16.msra.mxu0 %v148_v1  ;;  %v150_v3 = vld [vmem:[%s196_s0] sm:$0xff]  }
   0x3   :  { %140 = vmatprep.subr.bf16.mxu0 %v151_v0  ;;  %v130_v12 = vld [vmem:[%s197_s2] ss:$0 sm:$0xff] }
   0x6   :  { %141 = vmatpush3.bf16.msra.mxu0 %v149_v2 }
   0x8   :  { %v22_v4 = vld [vmem:[#allocation2] sm:$0xff]  ;;  %v23_v6 = vld [vmem:[#allocation2 + $0x8] sm:$0xff] }
   0x9   :  { %143 = vmatmul.mubr.msk.bf16.vlgmr.msra.gmra.mrb[0].mxu0 %vm47_vm2, %v150_v3 }
  0xdc   :  { %v85_v5 = vpop.f32.mrb[0].mxu0 }
  0xdd   :  { %v92_v7 = vadd.f32 %v85_v5, %v22_v4  ;;  %v144_v8 = vpop.f32.mrb[1].mxu0 }
  0xde   :  { %v88_v9 = vpop.f32.mrb[2].mxu0 }
  0xdf   :  { %95 = vst.msk [vmem:[#allocation2] sm:$0xff] %vm19_vm0, %v92_v7  ;;  %v93_v10 = vadd.f32 %v88_v9, %v23_v6  ;;  %v145_v11 = vpop.f32.mrb[3].mxu0 }
  0xe1   :  { %96 = vst.msk [vmem:[#allocation2 + $0x8] sm:$0xff] %vm19_vm0, %v93_v10 }
  0xe6   :  { %v100_v13 = vld [vmem:[#allocation2] sm:$0xff] }
  0xe7   :  { %v109_v14 = vadd.f32 %v130_v12, %v100_v13 }
  0xe8   :  { %v101_v15 = vld [vmem:[#allocation2 + $0x8] sm:$0xff] }
  0xe9   :  { %v133_v16 = vpack.c.bf16 %v109_v14, %v109_v14  ;;  %v110_v17 = vadd.f32 %v130_v12, %v101_v15 }
  0xeb   :  { %120 = vst.msk [vmem:[%s198_s3] sm:$0xf] %vm119_vm3, %v133_v16  ;;  %v134_v18 = vpack.c.bf16 %v110_v17, %v110_v17 }
  0xed   :  { %121 = vst.msk [vmem:[%s198_s3 + $0x4] sm:$0xf] %vm119_vm3, %v134_v18 }

// kernel: transformer_forward.33
= control target key start
LH: loop header
LB: loop body
LE: loop exit
PB: predicated region body
PF: predicated region fallthrough
CT: control target
= control target key end

     0   :  { %vm28_vm0 = vcmask 261120   ;;  %v247_v0 = vmov 0.0   ;;  %vm248_vm1 = vmmov 0   ;;  %vm72_vm2 = vcmask 523264   ;;  %s325_s1 = inlined_call_operand.vmem [shape: bf16[64,32], index: 1, kind: input, shape index: {}]   ;;  %s326_s0 = inlined_call_operand.vmem [shape: bf16[16,64], index: 0, kind: input, shape index: {}]   ;;  %s327_s3 = inlined_call_operand.vmem [shape: bf16[16,32], index: 3, kind: input, shape index: {}]   ;;  %s328_s2 = inlined_call_operand.vmem [shape: f32[1,32], index: 2, kind: input, shape index: {}]   ;;  %s329_s4 = inlined_call_operand.vmem [shape: f32[1,32], index: 4, kind: input, shape index: {}]   ;;  %s330_s5 = inlined_call_operand.vmem [shape: f32[1,32], index: 5, kind: input, shape index: {}]   ;;  %s331_s6 = inlined_call_operand.vmem [shape: bf16[16,32], index: 6, kind: output, shape index: {}]  }
   0x1   :  { %224 = vmatprep.subr.bf16.mxu0 %v247_v0  ;;  %v238_v1 = vld [vmem:[%s325_s1] sm:$0xff]   ;;  %232 = vmatprep.mubr.msk.bf16.mxu0 %vm248_vm1, %v247_v0  ;;  %29 = vst.msk [vmem:[#allocation2] sm:$0xff] %vm28_vm0, %v247_v0  ;;  %30 = vst.msk [vmem:[#allocation2 + $0x8] sm:$0xff] %vm28_vm0, %v247_v0  ;;  %v239_v2 = vld [vmem:[%s325_s1 + $0x8] sm:$0xff]   ;;  %vm195_vm3 = vcmask 257024  }
   0x2   :  { %225 = vmatpush3.bf16.msra.mxu0 %v238_v1  ;;  %v240_v3 = vld [vmem:[%s325_s1 + $0x10] sm:$0xff]   ;;  %v241_v4 = vld [vmem:[%s325_s1 + $0x18] sm:$0xff]   ;;  %v242_v5 = vld [vmem:[%s326_s0] sm:$0xff]  }
   0x3   :  { %226 = vmatprep.subr.bf16.mxu0 %v247_v0  ;;  %v216_v14 = vld [vmem:[%s327_s3] sm:$0xff]  }
   0x4   :  { %v208_v15 = vld [vmem:[%s328_s2] ss:$0 sm:$0xff]  ;;  %v217_v16 = vunpack.c.l.bf16 %v216_v14  ;;  %v218_v19 = vunpack.c.h.bf16 %v216_v14 }
   0x5   :  { %v209_v43 = vld [vmem:[%s329_s4] ss:$0 sm:$0xff] }
   0x6   :  { %227 = vmatpush3.bf16.msra.mxu0 %v239_v2  ;;  %v210_v45 = vld [vmem:[%s330_s5] ss:$0 sm:$0xff] }
   0x7   :  { %228 = vmatprep.subr.bf16.mxu0 %v247_v0 }
   0x8   :  { %v31_v6 = vld [vmem:[#allocation2] sm:$0xff]  ;;  %v32_v8 = vld [vmem:[#allocation2 + $0x8] sm:$0xff] }
   0xa   :  { %229 = vmatpush3.bf16.msra.mxu0 %v240_v3 }
   0xb   :  { %230 = vmatprep.subr.bf16.mxu0 %v247_v0 }
   0xe   :  { %231 = vmatpush3.bf16.msra.mxu0 %v241_v4 }
  0x11   :  { %233 = vmatmul.mubr.msk.bf16.vlgmr.msra.gmra.mrb[0].mxu0 %vm72_vm2, %v242_v5 }
  0xe4   :  { %v110_v7 = vpop.f32.mrb[0].mxu0 }
  0xe5   :  { %v117_v9 = vadd.f32 %v110_v7, %v31_v6  ;;  %v234_v10 = vpop.f32.mrb[1].mxu0 }
  0xe6   :  { %v113_v11 = vpop.f32.mrb[2].mxu0 }
  0xe7   :  { %120 = vst.msk [vmem:[#allocation2] sm:$0xff] %vm28_vm0, %v117_v9  ;;  %v118_v12 = vadd.f32 %v113_v11, %v32_v8  ;;  %v235_v13 = vpop.f32.mrb[3].mxu0 }
  0xe9   :  { %121 = vst.msk [vmem:[#allocation2 + $0x8] sm:$0xff] %vm28_vm0, %v118_v12 }
  0xee   :  { %v125_v17 = vld [vmem:[#allocation2] sm:$0xff] }
  0xef   :  { %v134_v18 = vadd.f32 %v208_v15, %v125_v17 }
  0xf0   :  { %v126_v20 = vld [vmem:[#allocation2 + $0x8] sm:$0xff] }
  0xf1   :  { %v140_v21 = vadd.f32 %v217_v16, %v134_v18  ;;  %v135_v22 = vadd.f32 %v208_v15, %v126_v20 }
  0xf3   :  { %v142_v23 = vsel %vm28_vm0, %v140_v21, 0.0  ;;  %v141_v24 = vadd.f32 %v218_v19, %v135_v22 }
  0xf4   :  { %143 = vadd.xlane.f32.xlu0 %v142_v23 }
  0xf5   :  { %v145_v25 = vsel %vm28_vm0, %v141_v24, 0.0 }
  0xf8   :  { %146 = vadd.xlane.f32.xlu0 %v145_v25 }
 0x181   :  { %v144_v26 = vpop.xlane.xlu0 %143 }
 0x182   :  { %v149_v27 = vmul.f32 0.03125, %v144_v26 }
 0x184   :  { %v151_v28 = vsub.f32 %v140_v21, %v149_v27 }
 0x185   :  { %v147_v29 = vpop.xlane.xlu0 %146 }
 0x186   :  { %v150_v30 = vmul.f32 0.03125, %v147_v29  ;;  %v153_v31 = vmul.f32 %v151_v28, %v151_v28 }
 0x188   :  { %v152_v32 = vsub.f32 %v141_v24, %v150_v30  ;;  %v155_v33 = vsel %vm28_vm0, %v153_v31, 0.0 }
 0x189   :  { %156 = vadd.xlane.f32.xlu1 %v155_v33 }
 0x18a   :  { %v154_v34 = vmul.f32 %v152_v32, %v152_v32 }
 0x18c   :  { %v158_v35 = vsel %vm28_vm0, %v154_v34, 0.0 }
 0x18d   :  { %159 = vadd.xlane.f32.xlu1 %v158_v35 }
 0x216   :  { %v157_v36 = vpop.xlane.xlu1 %156 }
 0x217   :  { %v161_v37 = vmul.f32 0.03125, %v157_v36 }
 0x219   :  { %v163_v38 = vadd.f32 1e-05, %v161_v37 }
 0x21a   :  { %v160_v39 = vpop.xlane.xlu1 %159 }
 0x21b   :  { %243 = vrsqrt.f32 %v163_v38  ;;  %v162_v40 = vmul.f32 0.03125, %v160_v39 }
 0x21d   :  { %v164_v41 = vadd.f32 1e-05, %v162_v40 }
 0x21f   :  { %245 = vrsqrt.f32 %v164_v41 }
 0x225   :  { %v244_v42 = vpop.eup %243 }
 0x226   :  { %v167_v44 = vmul.f32 %v244_v42, %v151_v28 }
 0x228   :  { %v176_v46 = vmul.f32 %v209_v43, %v167_v44 }
 0x229   :  { %v246_v47 = vpop.eup %245 }
 0x22a   :  { %v185_v48 = vadd.f32 %v210_v45, %v176_v46  ;;  %v168_v49 = vmul.f32 %v246_v47, %v152_v32 }
 0x22c   :  { %v213_v50 = vpack.c.bf16 %v185_v48, %v185_v48  ;;  %v177_v51 = vmul.f32 %v209_v43, %v168_v49 }
 0x22e   :  { %196 = vst.msk [vmem:[%s331_s6] sm:$0xf] %vm195_vm3, %v213_v50  ;;  %v186_v52 = vadd.f32 %v210_v45, %v177_v51 }
 0x230   :  { %v214_v53 = vpack.c.bf16 %v186_v52, %v186_v52 }
 0x232   :  { %197 = vst.msk [vmem:[%s331_s6 + $0x4] sm:$0xf] %vm195_vm3, %v214_v53 }

// kernel: transformer_forward.57
= control target key start
LH: loop header
LB: loop body
LE: loop exit
PB: predicated region body
PF: predicated region fallthrough
CT: control target
= control target key end

     0   :  { %v176_v1 = vmov 0.0   ;;  %vm177_vm0 = vmmov 0   ;;  %s225_s0 = inlined_call_operand.vmem [shape: bf16[16,32], index: 0, kind: input, shape index: {}]   ;;  %s226_s1 = inlined_call_operand.vmem [shape: bf16[32,128], index: 1, kind: input, shape index: {}]   ;;  %s227_s2 = inlined_call_operand.vmem [shape: f32[1,128], index: 2, kind: input, shape index: {}]   ;;  %s228_s3 = inlined_call_operand.hbm [shape: f32[16,128], index: 3, kind: output, shape index: {}]  }
   0x1   :  { %v149_v0 = vld [vmem:[%s226_s1] sm:$0xff]   ;;  %136 = vmatprep.subr.bf16.mxu0 %v176_v1  ;;  %v150_v2 = vld [vmem:[%s226_s1 + $0x8] sm:$0xff]   ;;  %140 = vmatprep.mubr.msk.bf16.mxu0 %vm177_vm0, %v176_v1 }
   0x2   :  { %137 = vmatpush3.bf16.msra.mxu0 %v149_v0 }
   0x3   :  { %138 = vmatprep.subr.bf16.mxu0 %v176_v1 }
   0x4   :  { %8 = vsyncpa [#allocation4], 0  ;;  %v151_v3 = vld [vmem:[%s225_s0] sm:$0xff]   ;;  %vm47_vm1 = vcmask 261120   ;;  %s178_s20 = smov [#allocation3]  }
   0x5   :  { %v132_v4 = vld [vmem:[%s227_s2] ss:$0 sm:$0xff]  ;;  %s117_s21 = sshll.u32 %s178_s20, 4  ;;  %s118_s21 = int_to_ptr.vmem [resolvable:$true] %s117_s21 }
   0x6   :  { %139 = vmatpush3.bf16.msra.mxu0 %v150_v2  ;;  %s152_s1 = scalar_lea.vmem %s118_s21, 256  ;;  %p157_p1 = scmp.lt.s32.totalorder %s118_s21, %s118_s21 }
   0x7   :  { %p153_p0 = scmp.ne.s32.totalorder %s118_s21, %s152_s1  ;;  %p158_p2 = scmp.lt.s32.totalorder %s152_s1, %s152_s1 }
   0x9   :  { %141 = vmatmul.mubr.msk.bf16.vlgmr.msra.gmra.mrb[0].mxu0 %vm47_vm1, %v151_v3  ;;  %p159_p3 = por %p158_p2, %p157_p1 }
   0xb   :  { %p160_p4 = pnand %p159_p3, %p153_p0 }
  0xdc   :  { %v85_v5 = vpop.f32.mrb[0].mxu0 }
  0xdd   :  { %v108_v6 = vadd.f32 %v132_v4, %v85_v5  ;;  %v142_v7 = vpop.f32.mrb[1].mxu0 }
  0xde   :  { %v88_v8 = vpop.f32.mrb[2].mxu0 }
  0xdf   :  { %110 = vst [vmem:[#allocation3] sm:$0xff] %v108_v6  ;;  %v109_v9 = vadd.f32 %v132_v4, %v88_v8  ;;  %v143_v10 = vpop.f32.mrb[3].mxu0 }
  0xe1   :  { %111 = vst [vmem:[#allocation3 + $0x8] sm:$0xff] %v109_v9 }
  0xe2   :  { %163 = shalt.err (!%p160_p4)
}
  0xe3   :  { %s164_s22 = scalar_lea.hbm %s228_s3, 256 }
  0xe4   :  { %p165_p5 = scmp.ne.s32.totalorder %s228_s3, %s164_s22  ;;  %p168_p6 = scmp.lt.u32.totalorder %s164_s22, %s228_s3 }
  0xe6   :  { %p170_p7 = pnand %p168_p6, %p165_p5 }
  0xe8   :  { %173 = shalt.err (!%p170_p7)
}
  0xe9   :  { %s179_s27 = smov 128   ;;  %s180_s28 = smov 8  }
  0xea   :  { %123 = dma.vmem_to_hbm [thread:$0]  %s118_s21, 256, %s228_s3, [#allocation4], %s179_s27, %s179_s27, %s180_s28  }
  0xeb   :  { %174 = dma.done.wait [#allocation4], 256  }
  0xec   :  { %175 = vsyncadd [#allocation4], 4294967040 }
  0xed   :  { %127 = vsyncpa [#allocation4], 1 }

// kernel: transformer_forward.40
= control target key start
LH: loop header
LB: loop body
LE: loop exit
PB: predicated region body
PF: predicated region fallthrough
CT: control target
= control target key end

     0   :  { %s1085_s15 = smov 0   ;;  %s1087_s16 = smov 0   ;;  %s1213_s0 = inlined_call_operand.vmem [shape: bf16[2,8,32], index: 0, kind: input, shape index: {}]   ;;  %s1214_s1 = inlined_call_operand.vmem [shape: bf16[2,8,32], index: 1, kind: input, shape index: {}]   ;;  %s1215_s2 = inlined_call_operand.vmem [shape: bf16[2,8,32], index: 2, kind: input, shape index: {}]   ;;  %s1216_s3 = inlined_call_operand.vmem [shape: s32[2,1,8], index: 3, kind: input, shape index: {}]   ;;  %s1217_s4 = inlined_call_operand.vmem [shape: bf16[2,8,32], index: 4, kind: output, shape index: {}]  }
   0x1   :  { %s1089_s17 = smov 0  }
   0x2 LB: > { %s26_s18 = sadd.s32 1, %s1045_s16  ;;  %p887_p0 = scmp.ge.s32.totalorder %s1049_s17, 1  ;;  %s1049_s17 = sphi %s1089_s17, %s14_s17   ;;  %s1045_s16 = sphi %s1087_s16, %s1221_s16   ;;  %s1041_s15 = sphi %s1085_s15, %s1220_s15  }
   0x3   : > { %p28_p1 = scmp.ge.s32.totalorder %s26_s18, 2  ;;  %p206_p2 = scmp.lt.s32.totalorder %s1049_s17, 3 }
   0x5   : > { %s1223_s18 = smov (%p28_p1, %s26_s18), 0  ;;  %p207_p3 = pnand %p887_p0, %p206_p2 }
   0x6   : > { %p247_p4 = scmp.lt.s32.totalorder (!%p207_p3), %s1041_s15, 1  ;;  %v1051_v0 = vmov (!%p207_p3), 0.0   ;;  %vm1052_vm0 = vmmov (!%p207_p3), 0   ;;  %vm293_vm1 = vcmask (!%p207_p3), 64512   ;;  %v279_v4 = vlaneseq (!%p207_p3)  ;;  %s1054_s29 = smov (!%p207_p3), 120  }
   0x7   : > { %210 = sbr.rel (%p207_p3) target bundleno = 1479 (0x5c7), region = 36  ;;  %927 = vmatprep.subr.bf16.mxu0 (!%p207_p3), %v1051_v0  ;;  %929 = vmatprep.mubr.msk.bf16.mxu0 (!%p207_p3), %vm1052_vm0, %v1051_v0  ;;  %v1053_v8 = vmov (!%p207_p3), 0   ;;  %s1055_s30 = smov (!%p207_p3), 112   ;;  %vm357_vm6 = vcmask (!%p207_p3), 1043456   ;;  %vm402_vm7 = vcmask (!%p207_p3), 60416   ;;  %vm532_vm8 = vcmask (!%p207_p3), 126016  }
   0x8   : > { %933 = vmatprep.subr.bf16.mxu1 (!%p207_p3), %v1051_v0  ;;  %935 = vmatprep.mubr.msk.bf16.mxu1 (!%p207_p3), %vm1052_vm0, %v1051_v0  ;;  %v280_v6 = vshrl.u32 (!%p207_p3), %v279_v4, 7  ;;  %v290_v11 = vand.u32 (!%p207_p3), 127, %v279_v4  ;;  %s1056_s5 = smov (!%p207_p3), 104   ;;  %s1057_s12 = smov (!%p207_p3), 8   ;;  %vm653_vm9 = vcmask (!%p207_p3), 191616   ;;  %vm774_vm10 = vcmask (!%p207_p3), 257216  }
   0x9   : > { %s1058_s13 = smov (!%p207_p3), 16   ;;  %s1059_s14 = smov (!%p207_p3), 24  }
   0xa   : > { %v281_v7 = vsub.s32 (!%p207_p3), 0, %v280_v6  ;;  %vm291_vm4 = vcmp.le.s32.totalorder (!%p207_p3), %v290_v11, %v280_v6 }
   0xe   : > { %s1225_s15 = smov (!%p247_p4, %s1041_s15), 1 }
   0xf   : > { %s1109_s19 = sshll.u32 %s1225_s15, 2  ;;  %s264_s28 = scalar_lea.vmem %s1216_s3, %s1225_s15 }
  0x10   : > { %s257_s22 = scalar_lea.vmem %s1214_s1, %s1109_s19  ;;  %s253_s25 = scalar_lea.vmem %s1213_s0, %s1109_s19  ;;  %v276_v5 = vld [vmem:[%s264_s28] sm:$0x1] }
  0x11   : > { %v274_v1 = vld [vmem:[%s257_s22] sm:$0xf]  ;;  %vm277_vm2 = vcmp.ne.s32.totalorder %v276_v5, 0  ;;  %s261_s8 = scalar_lea.vmem %s1215_s2, %s1109_s19  ;;  %s1169_s11 = scalar_lea.vmem %s1217_s4, %s1109_s19 }
  0x12   : > { %v298_v2 = vsel %vm293_vm1, %v274_v1, 0  ;;  %v273_v3 = vld [vmem:[%s253_s25] sm:$0xf]  ;;  %v278_v9 = vsel %vm277_vm2, 1, %v1053_v8  ;;  %v895_v20 = vcombine.low %v274_v1, %v274_v1 }
  0x13   : > { %928 = vmatpush3.bf16.xpose.msra.mxu0 %v298_v2  ;;  %v282_v10 = vrot.slane %v278_v9, %v281_v7  ;;  %v894_v21 = vcombine.low %v273_v3, %v273_v3  ;;  %v1144_v27 = vld [vmem:[%s261_s8] sm:$0xf] }
  0x14   : > { %945 = vmatprep.subr.bf16.mxu0 %v1051_v0  ;;  %412 = vrot.lane.b32.xlu1 %v895_v20, %s1054_s29  ;;  %v359_v28 = vsel %vm357_vm6, %v1144_v27, 0 }
  0x15   : > { %vm283_vm3 = vcmp.eq.s32.totalorder %v282_v10, 1  ;;  %934 = vmatpush3.bf16.msra.mxu1 %v359_v28 }
  0x16   : > { %vm1127_vm5 = vmand %vm283_vm3, %vm291_vm4  ;;  %939 = vmatprep.subr.bf16.mxu1 %v1051_v0 }
  0x18   : > { %407 = vrot.lane.b32.xlu1 %v894_v21, %s1054_s29 }
  0x1a   : > { %930 = vmatmul.mubr.msk.bf16.vlgmr.msra.gmra.mrb[0].mxu0 %vm293_vm1, %v273_v3 }
  0x1b   : > { %947 = vmatprep.mubr.msk.bf16.mxu0 %vm1052_vm0, %v1051_v0 }
  0x1c   : > { %534 = vrot.lane.b32.xlu1 %v894_v21, %s1055_s30 }
  0x20   : > { %657 = vrot.lane.b32.xlu1 %v895_v20, %s1056_s5 }
  0x24   : > { %655 = vrot.lane.b32.xlu1 %v894_v21, %s1056_s5 }
  0x86   : > { %v413_v31 = vpop.permute.xlu1 %412 }
  0x87   : > { %v418_v33 = vsel %vm293_vm1, %v413_v31, 0 }
  0x8a   : > { %v408_v35 = vpop.permute.xlu1 %407 }
  0x8e   : > { %v535_v37 = vpop.permute.xlu1 %534 }
  0x92   : > { %v658_v39 = vpop.permute.xlu1 %657 }
  0x93   : > { %v663_v40 = vsel %vm293_vm1, %v658_v39, 0 }
  0x96   : > { %v656_v41 = vpop.permute.xlu1 %655 }
  0xed   : > { %v334_v12 = vpop.f32.mrb[0].mxu0 }
  0xee   : > { %v340_v14 = vmul.f32 0.35355338, %v334_v12  ;;  %v931_v15 = vpop.f32.mrb[1].mxu0 }
  0xef   : > { %v337_v16 = vpop.f32.mrb[2].mxu0  ;;  %v897_v15 = vcombine.low %v1144_v27, %v1144_v27 }
  0xf0   : > { %v932_v17 = vpop.f32.mrb[3].mxu0  ;;  %v341_v18 = vsel %vm1127_vm5, %v340_v14, -1e+30 }
  0xf1   : > { %v342_v19 = vsel %vm293_vm1, %v341_v18, -inf }
  0xf2   : > { %343 = vmax.xlane.f32.xlu0 %v342_v19 }
 0x17f   : > { %v344_v22 = vpop.xlane.xlu0 %343 }
 0x180   : > { %v345_v23 = vsub.f32 %v341_v18, %v344_v22 }
 0x182   : > { %v346_v24 = vmul.f32 1.442695, %v345_v23 }
 0x184   : > { %1011 = vpow2.f32 %v346_v24 }
 0x18e   : > { %v1012_v25 = vpop.eup %1011 }
 0x18f   : > { %v348_v26 = vsel %vm293_vm1, %v1012_v25, 0.0 }
 0x190   : > { %349 = vadd.xlane.f32.xlu0 %v348_v26 }
 0x1a6   : > { %536 = vrot.lane.b32.xlu0 %v895_v20, %s1055_s30 }
 0x21d   : > { %v350_v29 = vpop.xlane.xlu0 %349 }
 0x21e   : > { %1013 = vrcp.f32 %v350_v29 }
 0x221   : > { %v537_v36 = vpop.permute.xlu0 %536 }
 0x222   : > { %v542_v38 = vsel %vm293_vm1, %v537_v36, 0 }
 0x228   : > { %v1014_v30 = vpop.eup %1013 }
 0x229   : > { %v352_v32 = vmul.f32 %v1014_v30, %v1012_v25 }
 0x22b   : > { %v353_v34 = vpack.c.bf16 %v352_v32, %v352_v32 }
 0x22d   : > { %936 = vmatmul.mubr.msk.bf16.vlgmr.msra.gmra.mrb[0].mxu1 %vm293_vm1, %v353_v34 }
 0x22e   : > { %940 = vmatpush3.bf16.xpose.msra.mxu1 %v418_v33  ;;  %941 = vmatprep.mubr.msk.bf16.mxu1 %vm1052_vm0, %v1051_v0 }
 0x22f   : > { %951 = vmatprep.subr.bf16.mxu1 %v1051_v0 }
 0x235   : > { %942 = vmatmul.mubr.msk.bf16.vlgmr.msra.gmra.mrb[4].mxu1 %vm293_vm1, %v408_v35 }
 0x236   : > { %952 = vmatpush3.bf16.xpose.msra.mxu1 %v542_v38  ;;  %953 = vmatprep.mubr.msk.bf16.mxu1 %vm1052_vm0, %v1051_v0 }
 0x237   : > { %963 = vmatprep.subr.bf16.mxu1 %v1051_v0 }
 0x23d   : > { %954 = vmatmul.mubr.msk.bf16.vlgmr.msra.gmra.mrb[8].mxu1 %vm293_vm1, %v535_v37 }
 0x23e   : > { %964 = vmatpush3.bf16.xpose.msra.mxu1 %v663_v40  ;;  %965 = vmatprep.mubr.msk.bf16.mxu1 %vm1052_vm0, %v1051_v0 }
 0x245   : > { %966 = vmatmul.mubr.msk.bf16.vlgmr.msra.gmra.mrb[12].mxu1 %vm293_vm1, %v656_v41 }
 0x300   : > { %v395_v42 = vpop.f32.mrb[0].mxu1 }
 0x301   : > { %v401_v43 = vpack.c.bf16 %v395_v42, %v395_v42  ;;  %v937_v44 = vpop.f32.mrb[1].mxu1 }
 0x302   : > { %v398_v45 = vpop.f32.mrb[2].mxu1 }
 0x303   : > { %403 = vst.msk [vmem:[%s1169_s11] sm:$0xf] %vm402_vm7, %v401_v43  ;;  %v938_v46 = vpop.f32.mrb[3].mxu1 }
 0x308   : > { %v454_v47 = vpop.f32.mrb[4].mxu1 }
 0x309   : > { %v460_v48 = vmul.f32 0.35355338, %v454_v47  ;;  %v943_v49 = vpop.f32.mrb[5].mxu1 }
 0x30a   : > { %v457_v50 = vpop.f32.mrb[6].mxu1 }
 0x30b   : > { %v944_v51 = vpop.f32.mrb[7].mxu1  ;;  %v461_v52 = vsel %vm1127_vm5, %v460_v48, -1e+30 }
 0x30c   : > { %v462_v53 = vsel %vm293_vm1, %v461_v52, -inf }
 0x30d   : > { %463 = vmax.xlane.f32.xlu1 %v462_v53 }
 0x310   : > { %v578_v54 = vpop.f32.mrb[8].mxu1 }
 0x311   : > { %v584_v55 = vmul.f32 0.35355338, %v578_v54  ;;  %v955_v56 = vpop.f32.mrb[9].mxu1 }
 0x312   : > { %v581_v57 = vpop.f32.mrb[10].mxu1 }
 0x313   : > { %v585_v58 = vsel %vm1127_vm5, %v584_v55, -1e+30  ;;  %v956_v59 = vpop.f32.mrb[11].mxu1 }
 0x314   : > { %v586_v60 = vsel %vm293_vm1, %v585_v58, -inf }
 0x315   : > { %587 = vmax.xlane.f32.xlu0 %v586_v60 }
 0x318   : > { %v699_v61 = vpop.f32.mrb[12].mxu1 }
 0x319   : > { %v705_v62 = vmul.f32 0.35355338, %v699_v61  ;;  %v967_v63 = vpop.f32.mrb[13].mxu1 }
 0x31a   : > { %v702_v1 = vpop.f32.mrb[14].mxu1 }
 0x31b   : > { %v706_v2 = vsel %vm1127_vm5, %v705_v62, -1e+30  ;;  %v968_v3 = vpop.f32.mrb[15].mxu1 }
 0x31c   : > { %v707_v4 = vsel %vm293_vm1, %v706_v2, -inf }
 0x31d   : > { %708 = vmax.xlane.f32.xlu1 %v707_v4 }
 0x39a   : > { %v464_v5 = vpop.xlane.xlu1 %463 }
 0x39b   : > { %v465_v6 = vsub.f32 %v461_v52, %v464_v5 }
 0x39d   : > { %v466_v7 = vmul.f32 1.442695, %v465_v6 }
 0x39f   : > { %1015 = vpow2.f32 %v466_v7 }
 0x3a2   : > { %v588_v8 = vpop.xlane.xlu0 %587 }
 0x3a3   : > { %v589_v9 = vsub.f32 %v585_v58, %v588_v8 }
 0x3a5   : > { %v590_v10 = vmul.f32 1.442695, %v589_v9 }
 0x3a7   : > { %1017 = vpow2.f32 %v590_v10 }
 0x3a9   : > { %v1016_v11 = vpop.eup %1015 }
 0x3aa   : > { %v468_v12 = vsel %vm293_vm1, %v1016_v11, 0.0  ;;  %v709_v16 = vpop.xlane.xlu1 %708 }
 0x3ab   : > { %469 = vadd.xlane.f32.xlu1 %v468_v12  ;;  %v710_v17 = vsub.f32 %v706_v2, %v709_v16 }
 0x3ad   : > { %v711_v18 = vmul.f32 1.442695, %v710_v17 }
 0x3af   : > { %1019 = vpow2.f32 %v711_v18 }
 0x3b1   : > { %v1018_v14 = vpop.eup %1017 }
 0x3b2   : > { %v592_v13 = vsel %vm293_vm1, %v1018_v14, 0.0 }
 0x3b3   : > { %593 = vadd.xlane.f32.xlu0 %v592_v13 }
 0x3b9   : > { %v1020_v19 = vpop.eup %1019 }
 0x3ba   : > { %v713_v20 = vsel %vm293_vm1, %v1020_v19, 0.0 }
 0x3bc   : > { %598 = vrot.lane.b32.xlu1 %v897_v15, %s1055_s30 }
 0x3c9   : > { %477 = vrot.lane.b32.xlu0 %v897_v15, %s1054_s29 }
 0x3e0   : > { %714 = vadd.xlane.f32.xlu1 %v713_v20 }
 0x3f1   : > { %719 = vrot.lane.b32.xlu1 %v897_v15, %s1056_s5 }
 0x438   : > { %v470_v21 = vpop.xlane.xlu1 %469 }
 0x439   : > { %1021 = vrcp.f32 %v470_v21 }
 0x43c   : > { %v599_v27 = vpop.permute.xlu1 %598 }
 0x43d   : > { %v604_v29 = vsel %vm357_vm6, %v599_v27, 0 }
 0x440   : > { %v594_v22 = vpop.xlane.xlu0 %593 }
 0x441   : > { %1023 = vrcp.f32 %v594_v22 }
 0x443   : > { %v1022_v23 = vpop.eup %1021 }
 0x444   : > { %v472_v24 = vmul.f32 %v1022_v23, %v1016_v11  ;;  %v478_v25 = vpop.permute.xlu0 %477 }
 0x445   : > { %v483_v26 = vsel %vm357_vm6, %v478_v25, 0 }
 0x446   : > { %946 = vmatpush3.bf16.msra.mxu0 %v483_v26  ;;  %v473_v28 = vpack.c.bf16 %v472_v24, %v472_v24 }
 0x447   : > { %957 = vmatprep.subr.bf16.mxu0 %v1051_v0 }
 0x449   : > { %948 = vmatmul.mubr.msk.bf16.vlgmr.msra.gmra.mrb[4].mxu0 %vm293_vm1, %v473_v28 }
 0x44a   : > { %958 = vmatpush3.bf16.msra.mxu0 %v604_v29  ;;  %959 = vmatprep.mubr.msk.bf16.mxu0 %vm1052_vm0, %v1051_v0 }
 0x44b   : > { %v1024_v30 = vpop.eup %1023  ;;  %969 = vmatprep.subr.bf16.mxu0 %v1051_v0 }
 0x44c   : > { %v596_v31 = vmul.f32 %v1024_v30, %v1018_v14 }
 0x44e   : > { %v597_v32 = vpack.c.bf16 %v596_v31, %v596_v31 }
 0x451   : > { %960 = vmatmul.mubr.msk.bf16.vlgmr.msra.gmra.mrb[8].mxu0 %vm293_vm1, %v597_v32 }
 0x452   : > { %971 = vmatprep.mubr.msk.bf16.mxu0 %vm1052_vm0, %v1051_v0 }
 0x46d   : > { %v715_v33 = vpop.xlane.xlu1 %714 }
 0x46e   : > { %1025 = vrcp.f32 %v715_v33 }
 0x471   : > { %v720_v34 = vpop.permute.xlu1 %719 }
 0x472   : > { %v725_v35 = vsel %vm357_vm6, %v720_v34, 0 }
 0x473   : > { %970 = vmatpush3.bf16.msra.mxu0 %v725_v35 }
 0x478   : > { %v1026_v36 = vpop.eup %1025 }
 0x479   : > { %v717_v37 = vmul.f32 %v1026_v36, %v1020_v19 }
 0x47b   : > { %v718_v38 = vpack.c.bf16 %v717_v37, %v717_v37 }
 0x47d   : > { %972 = vmatmul.mubr.msk.bf16.vlgmr.msra.gmra.mrb[12].mxu0 %vm293_vm1, %v718_v38 }
 0x51c   : > { %v519_v39 = vpop.f32.mrb[4].mxu0 }
 0x51d   : > { %v908_v40 = vpack.c.bf16 %v519_v39, %v519_v39  ;;  %v949_v41 = vpop.f32.mrb[5].mxu0 }
 0x51e   : > { %v522_v42 = vpop.f32.mrb[6].mxu0 }
 0x51f   : > { %529 = vrot.lane.b32.xlu0 %v908_v40, %s1057_s12  ;;  %v950_v43 = vpop.f32.mrb[7].mxu0 }
 0x524   : > { %v640_v44 = vpop.f32.mrb[8].mxu0 }
 0x525   : > { %v909_v0 = vpack.c.bf16 %v640_v44, %v640_v44  ;;  %v961_v45 = vpop.f32.mrb[9].mxu0 }
 0x526   : > { %v643_v46 = vpop.f32.mrb[10].mxu0 }
 0x527   : > { %650 = vrot.lane.b32.xlu1 %v909_v0, %s1058_s13  ;;  %v962_v47 = vpop.f32.mrb[11].mxu0 }
 0x550   : > { %v761_v48 = vpop.f32.mrb[12].mxu0 }
 0x551   : > { %v910_v49 = vpack.c.bf16 %v761_v48, %v761_v48  ;;  %v973_v50 = vpop.f32.mrb[13].mxu0 }
 0x552   : > { %v764_v51 = vpop.f32.mrb[14].mxu0 }
 0x553   : > { %771 = vrot.lane.b32.xlu0 %v910_v49, %s1059_s14  ;;  %v974_v52 = vpop.f32.mrb[15].mxu0 }
 0x591   : > { %v530_v53 = vpop.permute.xlu0 %529 }
 0x592   : > { %533 = vst.msk [vmem:[%s1169_s11] sm:$0xf] %vm532_vm8, %v530_v53 }
 0x599   : > { %v651_v54 = vpop.permute.xlu1 %650 }
 0x59a   : > { %654 = vst.msk [vmem:[%s1169_s11] sm:$0xf] %vm653_vm9, %v651_v54 }
 0x5c5   : > { %v772_v55 = vpop.permute.xlu0 %771 }
 0x5c6   : > { %775 = vst.msk [vmem:[%s1169_s11] sm:$0xf] %vm774_vm10, %v772_v55 }
 0x5c7 PF: > { %s14_s17 = sadd.s32 1, %s1049_s17   ;;  %s1220_s15 = smov %s1045_s16 }
 0x5c8   : > { %p11_p5 = scmp.ge.s32.totalorder %s14_s17, 4   ;;  %s1221_s16 = smov %s1223_s18 }
 0x5ca   :  { %13 = sbr.rel (!%p11_p5) target bundleno = 2 (0x2), region = 75 }

// kernel: transformer_forward.42
= control target key start
LH: loop header
LB: loop body
LE: loop exit
PB: predicated region body
PF: predicated region fallthrough
CT: control target
= control target key end

     0   :  { %vm19_vm0 = vcmask 261120   ;;  %v150_v0 = vmov 0.0   ;;  %vm151_vm1 = vmmov 0   ;;  %vm118_vm2 = vcmask 257024   ;;  %s195_s1 = inlined_call_operand.vmem [shape: bf16[32,32], index: 1, kind: input, shape index: {}]   ;;  %s196_s0 = inlined_call_operand.vmem [shape: bf16[16,32], index: 0, kind: input, shape index: {}]   ;;  %s197_s2 = inlined_call_operand.vmem [shape: f32[1,32], index: 2, kind: input, shape index: {}]   ;;  %s198_s3 = inlined_call_operand.vmem [shape: bf16[16,32], index: 3, kind: output, shape index: {}]  }
   0x1   :  { %137 = vmatprep.subr.bf16.mxu0 %v150_v0  ;;  %v147_v1 = vld [vmem:[%s195_s1] sm:$0xff]   ;;  %141 = vmatprep.mubr.msk.bf16.mxu0 %vm151_vm1, %v150_v0  ;;  %20 = vst.msk [vmem:[#allocation2] sm:$0xff] %vm19_vm0, %v150_v0  ;;  %21 = vst.msk [vmem:[#allocation2 + $0x8] sm:$0xff] %vm19_vm0, %v150_v0  ;;  %v148_v2 = vld [vmem:[%s195_s1 + $0x8] sm:$0xff]  }
   0x2   :  { %138 = vmatpush3.bf16.msra.mxu0 %v147_v1  ;;  %v149_v3 = vld [vmem:[%s196_s0] sm:$0xff]  }
   0x3   :  { %139 = vmatprep.subr.bf16.mxu0 %v150_v0  ;;  %v129_v12 = vld [vmem:[%s197_s2] ss:$0 sm:$0xff] }
   0x6   :  { %140 = vmatpush3.bf16.msra.mxu0 %v148_v2 }
   0x8   :  { %v22_v4 = vld [vmem:[#allocation2] sm:$0xff]  ;;  %v23_v6 = vld [vmem:[#allocation2 + $0x8] sm:$0xff] }
   0x9   :  { %142 = vmatmul.mubr.msk.bf16.vlgmr.msra.gmra.mrb[0].mxu0 %vm19_vm0, %v149_v3 }
  0xdc   :  { %v85_v5 = vpop.f32.mrb[0].mxu0 }
  0xdd   :  { %v92_v7 = vadd.f32 %v85_v5, %v22_v4  ;;  %v143_v8 = vpop.f32.mrb[1].mxu0 }
  0xde   :  { %v88_v9 = vpop.f32.mrb[2].mxu0 }
  0xdf   :  { %94 = vst.msk [vmem:[#allocation2] sm:$0xff] %vm19_vm0, %v92_v7  ;;  %v93_v10 = vadd.f32 %v88_v9, %v23_v6  ;;  %v144_v11 = vpop.f32.mrb[3].mxu0 }
  0xe1   :  { %95 = vst.msk [vmem:[#allocation2 + $0x8] sm:$0xff] %vm19_vm0, %v93_v10 }
  0xe6   :  { %v99_v13 = vld [vmem:[#allocation2] sm:$0xff] }
  0xe7   :  { %v108_v14 = vadd.f32 %v129_v12, %v99_v13 }
  0xe8   :  { %v100_v15 = vld [vmem:[#allocation2 + $0x8] sm:$0xff] }
  0xe9   :  { %v132_v16 = vpack.c.bf16 %v108_v14, %v108_v14  ;;  %v109_v17 = vadd.f32 %v129_v12, %v100_v15 }
  0xeb   :  { %119 = vst.msk [vmem:[%s198_s3] sm:$0xf] %vm118_vm2, %v132_v16  ;;  %v133_v18 = vpack.c.bf16 %v109_v17, %v109_v17 }
  0xed   :  { %120 = vst.msk [vmem:[%s198_s3 + $0x4] sm:$0xf] %vm118_vm2, %v133_v18 }

</bundles_post_ra>
